<compile_context>
chip_gen: v7x
topology: tpu7x:2x2x1
jax: 0.10.0
libtpu: 0.0.40
codegen_flags: <defaults>
</compile_context>

<pallas_src>
import jax
import jax.numpy as jnp
from jax import lax
from jax.experimental import pallas as pl
from jax.experimental.pallas import tpu as pltpu


# ---------------------------------------------------------------------------
# Fused Pallas kernel: maxpool2x2 -> conv3x3+BN+ReLU -> conv3x3+BN+ReLU
# ---------------------------------------------------------------------------
def _down_kernel(x_ref, w1_ref, b1_ref, w2_ref, b2_ref, o_ref,
                 pad1_ref, pad2_ref, patch1_ref, patch2_ref):
    # x_ref   : (1, Hp, Wp, 4*Cin)   input with the 2x2 pool window pre-split
    #                                into 4 contiguous Cin-chunks of the lane dim
    # w1_ref  : (9*Cin,  Cmid)       conv1 weights with BN1 scale folded in
    # b1_ref  : (1, Cmid)            conv1 bias + BN1 shift (folded)
    # w2_ref  : (9*Cmid, Cout)       conv2 weights with BN2 scale folded in
    # b2_ref  : (1, Cout)
    # o_ref   : (1, Cout, Hp*Wp)     lane-dense NCHW-style output
    # pad*_ref  : zero-halo'd activations (VMEM scratch, never touch HBM)
    # patch*_ref: im2col patch matrices (VMEM scratch)
    Hp, Wp = x_ref.shape[1], x_ref.shape[2]
    Cin = x_ref.shape[3] // 4
    Cmid = w1_ref.shape[1]
    HW = Hp * Wp

    # ---- MaxPool2d(2): the 2x2 window sits in 4 contiguous lane chunks,
    #      so the pool is just 3 vector maximums (no strided access).
    t = x_ref[0]                                            # (Hp, Wp, 4*Cin)
    pooled = jnp.maximum(
        jnp.maximum(t[:, :, 0 * Cin:1 * Cin], t[:, :, 1 * Cin:2 * Cin]),
        jnp.maximum(t[:, :, 2 * Cin:3 * Cin], t[:, :, 3 * Cin:4 * Cin]),
    )                                                       # (Hp, Wp, Cin)

    # ---- conv1 (3x3, pad=1) + folded BN + ReLU: single im2col matmul.
    pad1_ref[...] = jnp.zeros_like(pad1_ref)                # zero halo border
    pad1_ref[1:Hp + 1, 1:Wp + 1, :] = pooled
    for k in range(9):
        dy, dx = k // 3, k % 3
        patch1_ref[:, k * Cin:(k + 1) * Cin] = (
            pad1_ref[dy:dy + Hp, dx:dx + Wp, :].reshape(HW, Cin))
    h1 = jnp.dot(patch1_ref[...], w1_ref[...],
                 preferred_element_type=jnp.float32)        # (HW, Cmid), K=9*Cin
    h1 = jnp.maximum(h1 + b1_ref[...], 0.0)                 # f32 epilogue

    # ---- conv2 (3x3, pad=1) + folded BN + ReLU: single im2col matmul.
    pad2_ref[...] = jnp.zeros_like(pad2_ref)
    pad2_ref[1:Hp + 1, 1:Wp + 1, :] = h1.reshape(Hp, Wp, Cmid)
    for k in range(9):
        dy, dx = k // 3, k % 3
        patch2_ref[:, k * Cmid:(k + 1) * Cmid] = (
            pad2_ref[dy:dy + Hp, dx:dx + Wp, :].reshape(HW, Cmid))
    h2 = jnp.dot(patch2_ref[...], w2_ref[...],
                 preferred_element_type=jnp.float32)        # (HW, Cout), K=9*Cmid
    h2 = jnp.maximum(h2 + b2_ref[...], 0.0)

    # ---- lane-dense store: (Cout, Hp*Wp) == NCHW with H,W flattened.
    o_ref[0] = h2.T.astype(o_ref.dtype)


# ---------------------------------------------------------------------------
# Wrapper (layout plumbing + BN folding + pallas_call)
# ---------------------------------------------------------------------------
def _fold_bn_into_conv(w_hwio, conv_bias, gamma, beta, mean, var, eps=1e-5):
    """Fold eval-mode BatchNorm into conv weights/bias for the im2col matmul."""
    scale = gamma / jnp.sqrt(var + eps)                              # (Cout,)
    kh, kw, cin, cout = w_hwio.shape
    w2d = (w_hwio * scale[None, None, None, :]).reshape(kh * kw * cin, cout)
    b2d = ((conv_bias - mean) * scale + beta).reshape(1, cout)
    return w2d.astype(jnp.float32), b2d.astype(jnp.float32)


@jax.jit
def down_forward(x_nchw, params):
    """Pallas implementation of Down.forward. Input/output are NCHW float32."""
    N, Cin, H, W = x_nchw.shape
    Hp, Wp = H // 2, W // 2

    # Single wrapper-side layout op: channels-last + 2x2 pool-window pre-split.
    # The reshapes around the transpose are order-preserving (no data movement).
    xw = (x_nchw.reshape(N, Cin, Hp, 2, Wp, 2)
          .transpose(0, 2, 4, 3, 5, 1)
          .reshape(N, Hp, Wp, 4 * Cin))

    w1, b1 = _fold_bn_into_conv(params["w1"], params["b1"], params["g1"],
                                params["be1"], params["m1"], params["v1"])
    w2, b2 = _fold_bn_into_conv(params["w2"], params["b2"], params["g2"],
                                params["be2"], params["m2"], params["v2"])
    Cmid = w1.shape[1]
    Cout = w2.shape[1]

    out = pl.pallas_call(
        _down_kernel,
        out_shape=jax.ShapeDtypeStruct((N, Cout, Hp * Wp), x_nchw.dtype),
        grid=(N,),
        in_specs=[
            pl.BlockSpec((1, Hp, Wp, 4 * Cin), lambda n: (n, 0, 0, 0)),
            pl.BlockSpec((9 * Cin, Cmid), lambda n: (0, 0)),
            pl.BlockSpec((1, Cmid), lambda n: (0, 0)),
            pl.BlockSpec((9 * Cmid, Cout), lambda n: (0, 0)),
            pl.BlockSpec((1, Cout), lambda n: (0, 0)),
        ],
        out_specs=pl.BlockSpec((1, Cout, Hp * Wp), lambda n: (n, 0, 0)),
        scratch_shapes=[
            pltpu.VMEM((Hp + 2, Wp + 2, Cin), jnp.float32),    # halo'd pooled
            pltpu.VMEM((Hp + 2, Wp + 2, Cmid), jnp.float32),   # halo'd conv1 out
            pltpu.VMEM((Hp * Wp, 9 * Cin), jnp.float32),       # im2col patches 1
            pltpu.VMEM((Hp * Wp, 9 * Cmid), jnp.float32),      # im2col patches 2
        ],
        compiler_params=pltpu.CompilerParams(
            dimension_semantics=("parallel",),
            vmem_limit_bytes=32 * 1024 * 1024,   # safe on v5e/v6e/v7x
        ),
    )(xw, w1, b1, w2, b2)

    return out.reshape(N, Cout, Hp, Wp)          # free, order-preserving


# ---------------------------------------------------------------------------
# Pure-JAX reference (PyTorch eval-mode semantics) for verification
# ---------------------------------------------------------------------------
def down_reference(x_nchw, params, eps=1e-5):
    x = lax.reduce_window(x_nchw, -jnp.inf, lax.max,
                          (1, 1, 2, 2), (1, 1, 2, 2), "VALID")

    def conv_bn_relu(x, w_hwio, b, g, be, m, v):
        w_oihw = jnp.transpose(w_hwio, (3, 2, 0, 1))
        y = lax.conv_general_dilated(
            x, w_oihw, (1, 1), "SAME",
            dimension_numbers=("NCHW", "OIHW", "NCHW"))
        y = y + b[None, :, None, None]
        y = (y - m[None, :, None, None]) / jnp.sqrt(v[None, :, None, None] + eps)
        y = y * g[None, :, None, None] + be[None, :, None, None]
        return jnp.maximum(y, 0.0)

    x = conv_bn_relu(x, params["w1"], params["b1"], params["g1"],
                     params["be1"], params["m1"], params["v1"])
    x = conv_bn_relu(x, params["w2"], params["b2"], params["g2"],
                     params["be2"], params["m2"], params["v2"])
    return x


# ---------------------------------------------------------------------------
# Main
# ---------------------------------------------------------------------------
if __name__ == "__main__":
    N, C_in, H, W = 2, 4, 16, 16
    C_out = 8  # mid_channels == out_channels in DoubleConv

    key = jax.random.PRNGKey(0)
    ks = jax.random.split(key, 12)

    x = jax.random.normal(ks[0], (N, C_in, H, W), dtype=jnp.float32)

    params = {
        # conv1: Conv2d(C_in, C_out, 3, padding=1) weights stored HWIO
        "w1": 0.1 * jax.random.normal(ks[1], (3, 3, C_in, C_out), jnp.float32),
        "b1": 0.1 * jax.random.normal(ks[2], (C_out,), jnp.float32),
        # bn1 (eval-mode running stats)
        "g1": 1.0 + 0.1 * jax.random.normal(ks[3], (C_out,), jnp.float32),
        "be1": 0.1 * jax.random.normal(ks[4], (C_out,), jnp.float32),
        "m1": 0.1 * jax.random.normal(ks[5], (C_out,), jnp.float32),
        "v1": 0.5 + jax.random.uniform(ks[6], (C_out,), jnp.float32),
        # conv2: Conv2d(C_out, C_out, 3, padding=1)
        "w2": 0.1 * jax.random.normal(ks[7], (3, 3, C_out, C_out), jnp.float32),
        "b2": 0.1 * jax.random.normal(ks[8], (C_out,), jnp.float32),
        # bn2
        "g2": 1.0 + 0.1 * jax.random.normal(ks[9], (C_out,), jnp.float32),
        "be2": 0.1 * jax.random.normal(ks[10], (C_out,), jnp.float32),
        "m2": 0.1 * jax.random.normal(ks[11], (C_out,), jnp.float32),
        "v2": 0.5 + jax.random.uniform(jax.random.fold_in(key, 99),
                                       (C_out,), jnp.float32),
    }

    out = down_forward(x, params)
    out = jax.block_until_ready(out)

    ref = down_reference(x, params)
    assert out.shape == (N, C_out, H // 2, W // 2), out.shape
    assert jnp.allclose(out, ref, atol=1e-3, rtol=1e-3), (
        float(jnp.max(jnp.abs(out - ref))))

    print("KERNEL_OK")
</pallas_src>

<mosaic_0001>
module attributes {stable_mosaic.version = 11 : i64} {
  func.func @_down_kernel(%arg0: i32, %arg1: memref<1x8x8x16xf32, #tpu.memory_space<vmem>>, %arg2: memref<36x8xf32, #tpu.memory_space<vmem>>, %arg3: memref<1x8xf32, #tpu.memory_space<vmem>>, %arg4: memref<72x8xf32, #tpu.memory_space<vmem>>, %arg5: memref<1x8xf32, #tpu.memory_space<vmem>>, %arg6: memref<1x8x64xf32, #tpu.memory_space<vmem>>, %arg7: memref<10x10x4xf32, #tpu.memory_space<vmem>>, %arg8: memref<10x10x8xf32, #tpu.memory_space<vmem>>, %arg9: memref<64x36xf32, #tpu.memory_space<vmem>>, %arg10: memref<64x72xf32, #tpu.memory_space<vmem>>) attributes {dimension_semantics = [#tpu.dimension_semantics<parallel>], iteration_bounds = array<i64: 2>, scalar_prefetch = 0 : i64, scratch_operands = 4 : i64, tpu.core_type = #tpu.core_type<tc>, window_params = [{transform_indices = @transform_0, window_bounds = array<i64: 1, 8, 8, 16>}, {pipeline_mode = #tpu.pipeline_mode<synchronous>, transform_indices = @transform_1, window_bounds = array<i64: 36, 8>}, {pipeline_mode = #tpu.pipeline_mode<synchronous>, transform_indices = @transform_2, window_bounds = array<i64: 1, 8>}, {pipeline_mode = #tpu.pipeline_mode<synchronous>, transform_indices = @transform_3, window_bounds = array<i64: 72, 8>}, {pipeline_mode = #tpu.pipeline_mode<synchronous>, transform_indices = @transform_4, window_bounds = array<i64: 1, 8>}, {transform_indices = @transform_5, window_bounds = array<i64: 1, 8, 64>}]} {
    %c0 = arith.constant 0 : index
    %c0_0 = arith.constant 0 : index
    %c0_1 = arith.constant 0 : index
    %c0_2 = arith.constant 0 : index
    %0 = vector.load %arg1[%c0, %c0_0, %c0_1, %c0_2] : memref<1x8x8x16xf32, #tpu.memory_space<vmem>>, vector<1x8x8x16xf32>
    %1 = vector.shape_cast %0 : vector<1x8x8x16xf32> to vector<8x8x16xf32>
    %2 = vector.extract_strided_slice %1 {offsets = [0, 0, 0], sizes = [8, 8, 4], strides = [1, 1, 1]} : vector<8x8x16xf32> to vector<8x8x4xf32>
    %3 = vector.extract_strided_slice %1 {offsets = [0, 0, 4], sizes = [8, 8, 4], strides = [1, 1, 1]} : vector<8x8x16xf32> to vector<8x8x4xf32>
    %4 = arith.maximumf %2, %3 : vector<8x8x4xf32>
    %5 = vector.extract_strided_slice %1 {offsets = [0, 0, 8], sizes = [8, 8, 4], strides = [1, 1, 1]} : vector<8x8x16xf32> to vector<8x8x4xf32>
    %6 = vector.extract_strided_slice %1 {offsets = [0, 0, 12], sizes = [8, 8, 4], strides = [1, 1, 1]} : vector<8x8x16xf32> to vector<8x8x4xf32>
    %7 = arith.maximumf %5, %6 : vector<8x8x4xf32>
    %8 = arith.maximumf %4, %7 : vector<8x8x4xf32>
    %cst = arith.constant 0.000000e+00 : f32
    %9 = vector.broadcast %cst : f32 to vector<10x10x4xf32>
    %c0_3 = arith.constant 0 : index
    %c0_4 = arith.constant 0 : index
    %c0_5 = arith.constant 0 : index
    %10 = vector.load %arg7[%c0_3, %c0_4, %c0_5] : memref<10x10x4xf32, #tpu.memory_space<vmem>>, vector<10x10x4xf32>
    tpu.vector_store %arg7[%c0_3, %c0_4, %c0_5], %9 {strides = array<i32>} : memref<10x10x4xf32, #tpu.memory_space<vmem>>, vector<10x10x4xf32>,
    %c1 = arith.constant 1 : index
    %c1_6 = arith.constant 1 : index
    %c0_7 = arith.constant 0 : index
    %11 = vector.load %arg7[%c1, %c1_6, %c0_7] : memref<10x10x4xf32, #tpu.memory_space<vmem>>, vector<8x8x4xf32>
    tpu.vector_store %arg7[%c1, %c1_6, %c0_7], %8 {strides = array<i32>} : memref<10x10x4xf32, #tpu.memory_space<vmem>>, vector<8x8x4xf32>,
    %c0_8 = arith.constant 0 : index
    %c0_9 = arith.constant 0 : index
    %c0_10 = arith.constant 0 : index
    %12 = vector.load %arg7[%c0_8, %c0_9, %c0_10] : memref<10x10x4xf32, #tpu.memory_space<vmem>>, vector<8x8x4xf32>
    %13 = vector.shape_cast %12 : vector<8x8x4xf32> to vector<64x4xf32>
    %c0_11 = arith.constant 0 : index
    %c0_12 = arith.constant 0 : index
    %14 = vector.load %arg9[%c0_11, %c0_12] : memref<64x36xf32, #tpu.memory_space<vmem>>, vector<64x4xf32>
    tpu.vector_store %arg9[%c0_11, %c0_12], %13 {strides = array<i32>} : memref<64x36xf32, #tpu.memory_space<vmem>>, vector<64x4xf32>,
    %c0_13 = arith.constant 0 : index
    %c1_14 = arith.constant 1 : index
    %c0_15 = arith.constant 0 : index
    %15 = vector.load %arg7[%c0_13, %c1_14, %c0_15] : memref<10x10x4xf32, #tpu.memory_space<vmem>>, vector<8x8x4xf32>
    %16 = vector.shape_cast %15 : vector<8x8x4xf32> to vector<64x4xf32>
    %c0_16 = arith.constant 0 : index
    %c4 = arith.constant 4 : index
    %17 = vector.load %arg9[%c0_16, %c4] : memref<64x36xf32, #tpu.memory_space<vmem>>, vector<64x4xf32>
    tpu.vector_store %arg9[%c0_16, %c4], %16 {strides = array<i32>} : memref<64x36xf32, #tpu.memory_space<vmem>>, vector<64x4xf32>,
    %c0_17 = arith.constant 0 : index
    %c2 = arith.constant 2 : index
    %c0_18 = arith.constant 0 : index
    %18 = vector.load %arg7[%c0_17, %c2, %c0_18] : memref<10x10x4xf32, #tpu.memory_space<vmem>>, vector<8x8x4xf32>
    %19 = vector.shape_cast %18 : vector<8x8x4xf32> to vector<64x4xf32>
    %c0_19 = arith.constant 0 : index
    %c8 = arith.constant 8 : index
    %20 = vector.load %arg9[%c0_19, %c8] : memref<64x36xf32, #tpu.memory_space<vmem>>, vector<64x4xf32>
    tpu.vector_store %arg9[%c0_19, %c8], %19 {strides = array<i32>} : memref<64x36xf32, #tpu.memory_space<vmem>>, vector<64x4xf32>,
    %c1_20 = arith.constant 1 : index
    %c0_21 = arith.constant 0 : index
    %c0_22 = arith.constant 0 : index
    %21 = vector.load %arg7[%c1_20, %c0_21, %c0_22] : memref<10x10x4xf32, #tpu.memory_space<vmem>>, vector<8x8x4xf32>
    %22 = vector.shape_cast %21 : vector<8x8x4xf32> to vector<64x4xf32>
    %c0_23 = arith.constant 0 : index
    %c12 = arith.constant 12 : index
    %23 = vector.load %arg9[%c0_23, %c12] : memref<64x36xf32, #tpu.memory_space<vmem>>, vector<64x4xf32>
    tpu.vector_store %arg9[%c0_23, %c12], %22 {strides = array<i32>} : memref<64x36xf32, #tpu.memory_space<vmem>>, vector<64x4xf32>,
    %c1_24 = arith.constant 1 : index
    %c1_25 = arith.constant 1 : index
    %c0_26 = arith.constant 0 : index
    %24 = vector.load %arg7[%c1_24, %c1_25, %c0_26] : memref<10x10x4xf32, #tpu.memory_space<vmem>>, vector<8x8x4xf32>
    %25 = vector.shape_cast %24 : vector<8x8x4xf32> to vector<64x4xf32>
    %c0_27 = arith.constant 0 : index
    %c16 = arith.constant 16 : index
    %26 = vector.load %arg9[%c0_27, %c16] : memref<64x36xf32, #tpu.memory_space<vmem>>, vector<64x4xf32>
    tpu.vector_store %arg9[%c0_27, %c16], %25 {strides = array<i32>} : memref<64x36xf32, #tpu.memory_space<vmem>>, vector<64x4xf32>,
    %c1_28 = arith.constant 1 : index
    %c2_29 = arith.constant 2 : index
    %c0_30 = arith.constant 0 : index
    %27 = vector.load %arg7[%c1_28, %c2_29, %c0_30] : memref<10x10x4xf32, #tpu.memory_space<vmem>>, vector<8x8x4xf32>
    %28 = vector.shape_cast %27 : vector<8x8x4xf32> to vector<64x4xf32>
    %c0_31 = arith.constant 0 : index
    %c20 = arith.constant 20 : index
    %29 = vector.load %arg9[%c0_31, %c20] : memref<64x36xf32, #tpu.memory_space<vmem>>, vector<64x4xf32>
    tpu.vector_store %arg9[%c0_31, %c20], %28 {strides = array<i32>} : memref<64x36xf32, #tpu.memory_space<vmem>>, vector<64x4xf32>,
    %c2_32 = arith.constant 2 : index
    %c0_33 = arith.constant 0 : index
    %c0_34 = arith.constant 0 : index
    %30 = vector.load %arg7[%c2_32, %c0_33, %c0_34] : memref<10x10x4xf32, #tpu.memory_space<vmem>>, vector<8x8x4xf32>
    %31 = vector.shape_cast %30 : vector<8x8x4xf32> to vector<64x4xf32>
    %c0_35 = arith.constant 0 : index
    %c24 = arith.constant 24 : index
    %32 = vector.load %arg9[%c0_35, %c24] : memref<64x36xf32, #tpu.memory_space<vmem>>, vector<64x4xf32>
    tpu.vector_store %arg9[%c0_35, %c24], %31 {strides = array<i32>} : memref<64x36xf32, #tpu.memory_space<vmem>>, vector<64x4xf32>,
    %c2_36 = arith.constant 2 : index
    %c1_37 = arith.constant 1 : index
    %c0_38 = arith.constant 0 : index
    %33 = vector.load %arg7[%c2_36, %c1_37, %c0_38] : memref<10x10x4xf32, #tpu.memory_space<vmem>>, vector<8x8x4xf32>
    %34 = vector.shape_cast %33 : vector<8x8x4xf32> to vector<64x4xf32>
    %c0_39 = arith.constant 0 : index
    %c28 = arith.constant 28 : index
    %35 = vector.load %arg9[%c0_39, %c28] : memref<64x36xf32, #tpu.memory_space<vmem>>, vector<64x4xf32>
    tpu.vector_store %arg9[%c0_39, %c28], %34 {strides = array<i32>} : memref<64x36xf32, #tpu.memory_space<vmem>>, vector<64x4xf32>,
    %c2_40 = arith.constant 2 : index
    %c2_41 = arith.constant 2 : index
    %c0_42 = arith.constant 0 : index
    %36 = vector.load %arg7[%c2_40, %c2_41, %c0_42] : memref<10x10x4xf32, #tpu.memory_space<vmem>>, vector<8x8x4xf32>
    %37 = vector.shape_cast %36 : vector<8x8x4xf32> to vector<64x4xf32>
    %c0_43 = arith.constant 0 : index
    %c32 = arith.constant 32 : index
    %38 = vector.load %arg9[%c0_43, %c32] : memref<64x36xf32, #tpu.memory_space<vmem>>, vector<64x4xf32>
    tpu.vector_store %arg9[%c0_43, %c32], %37 {strides = array<i32>} : memref<64x36xf32, #tpu.memory_space<vmem>>, vector<64x4xf32>,
    %c0_44 = arith.constant 0 : index
    %c0_45 = arith.constant 0 : index
    %39 = vector.load %arg9[%c0_44, %c0_45] : memref<64x36xf32, #tpu.memory_space<vmem>>, vector<64x36xf32>
    %c0_46 = arith.constant 0 : index
    %c0_47 = arith.constant 0 : index
    %40 = vector.load %arg2[%c0_46, %c0_47] : memref<36x8xf32, #tpu.memory_space<vmem>>, vector<36x8xf32>
    %cst_48 = arith.constant dense<0.000000e+00> : vector<64x8xf32>
    %41 = tpu.matmul %39, %40, %cst_48 {dimension_numbers = #tpu.dot_dimension_numbers<[1], [0], [0], [1], [0, 0, 1, 1], [], []>} : vector<64x36xf32>, vector<36x8xf32>, vector<64x8xf32> -> vector<64x8xf32>
    %c0_49 = arith.constant 0 : index
    %c0_50 = arith.constant 0 : index
    %42 = vector.load %arg3[%c0_49, %c0_50] : memref<1x8xf32, #tpu.memory_space<vmem>>, vector<1x8xf32>
    %43 = vector.broadcast %42 : vector<1x8xf32> to vector<64x8xf32>
    %44 = arith.addf %41, %43 : vector<64x8xf32>
    %cst_51 = arith.constant 0.000000e+00 : f32
    %45 = vector.broadcast %cst_51 : f32 to vector<64x8xf32>
    %46 = arith.maximumf %44, %45 : vector<64x8xf32>
    %cst_52 = arith.constant 0.000000e+00 : f32
    %47 = vector.broadcast %cst_52 : f32 to vector<10x10x8xf32>
    %c0_53 = arith.constant 0 : index
    %c0_54 = arith.constant 0 : index
    %c0_55 = arith.constant 0 : index
    %48 = vector.load %arg8[%c0_53, %c0_54, %c0_55] : memref<10x10x8xf32, #tpu.memory_space<vmem>>, vector<10x10x8xf32>
    tpu.vector_store %arg8[%c0_53, %c0_54, %c0_55], %47 {strides = array<i32>} : memref<10x10x8xf32, #tpu.memory_space<vmem>>, vector<10x10x8xf32>,
    %49 = vector.shape_cast %46 : vector<64x8xf32> to vector<8x8x8xf32>
    %c1_56 = arith.constant 1 : index
    %c1_57 = arith.constant 1 : index
    %c0_58 = arith.constant 0 : index
    %50 = vector.load %arg8[%c1_56, %c1_57, %c0_58] : memref<10x10x8xf32, #tpu.memory_space<vmem>>, vector<8x8x8xf32>
    tpu.vector_store %arg8[%c1_56, %c1_57, %c0_58], %49 {strides = array<i32>} : memref<10x10x8xf32, #tpu.memory_space<vmem>>, vector<8x8x8xf32>,
    %c0_59 = arith.constant 0 : index
    %c0_60 = arith.constant 0 : index
    %c0_61 = arith.constant 0 : index
    %51 = vector.load %arg8[%c0_59, %c0_60, %c0_61] : memref<10x10x8xf32, #tpu.memory_space<vmem>>, vector<8x8x8xf32>
    %52 = vector.shape_cast %51 : vector<8x8x8xf32> to vector<64x8xf32>
    %c0_62 = arith.constant 0 : index
    %c0_63 = arith.constant 0 : index
    %53 = vector.load %arg10[%c0_62, %c0_63] : memref<64x72xf32, #tpu.memory_space<vmem>>, vector<64x8xf32>
    tpu.vector_store %arg10[%c0_62, %c0_63], %52 {strides = array<i32>} : memref<64x72xf32, #tpu.memory_space<vmem>>, vector<64x8xf32>,
    %c0_64 = arith.constant 0 : index
    %c1_65 = arith.constant 1 : index
    %c0_66 = arith.constant 0 : index
    %54 = vector.load %arg8[%c0_64, %c1_65, %c0_66] : memref<10x10x8xf32, #tpu.memory_space<vmem>>, vector<8x8x8xf32>
    %55 = vector.shape_cast %54 : vector<8x8x8xf32> to vector<64x8xf32>
    %c0_67 = arith.constant 0 : index
    %c8_68 = arith.constant 8 : index
    %56 = vector.load %arg10[%c0_67, %c8_68] : memref<64x72xf32, #tpu.memory_space<vmem>>, vector<64x8xf32>
    tpu.vector_store %arg10[%c0_67, %c8_68], %55 {strides = array<i32>} : memref<64x72xf32, #tpu.memory_space<vmem>>, vector<64x8xf32>,
    %c0_69 = arith.constant 0 : index
    %c2_70 = arith.constant 2 : index
    %c0_71 = arith.constant 0 : index
    %57 = vector.load %arg8[%c0_69, %c2_70, %c0_71] : memref<10x10x8xf32, #tpu.memory_space<vmem>>, vector<8x8x8xf32>
    %58 = vector.shape_cast %57 : vector<8x8x8xf32> to vector<64x8xf32>
    %c0_72 = arith.constant 0 : index
    %c16_73 = arith.constant 16 : index
    %59 = vector.load %arg10[%c0_72, %c16_73] : memref<64x72xf32, #tpu.memory_space<vmem>>, vector<64x8xf32>
    tpu.vector_store %arg10[%c0_72, %c16_73], %58 {strides = array<i32>} : memref<64x72xf32, #tpu.memory_space<vmem>>, vector<64x8xf32>,
    %c1_74 = arith.constant 1 : index
    %c0_75 = arith.constant 0 : index
    %c0_76 = arith.constant 0 : index
    %60 = vector.load %arg8[%c1_74, %c0_75, %c0_76] : memref<10x10x8xf32, #tpu.memory_space<vmem>>, vector<8x8x8xf32>
    %61 = vector.shape_cast %60 : vector<8x8x8xf32> to vector<64x8xf32>
    %c0_77 = arith.constant 0 : index
    %c24_78 = arith.constant 24 : index
    %62 = vector.load %arg10[%c0_77, %c24_78] : memref<64x72xf32, #tpu.memory_space<vmem>>, vector<64x8xf32>
    tpu.vector_store %arg10[%c0_77, %c24_78], %61 {strides = array<i32>} : memref<64x72xf32, #tpu.memory_space<vmem>>, vector<64x8xf32>,
    %c1_79 = arith.constant 1 : index
    %c1_80 = arith.constant 1 : index
    %c0_81 = arith.constant 0 : index
    %63 = vector.load %arg8[%c1_79, %c1_80, %c0_81] : memref<10x10x8xf32, #tpu.memory_space<vmem>>, vector<8x8x8xf32>
    %64 = vector.shape_cast %63 : vector<8x8x8xf32> to vector<64x8xf32>
    %c0_82 = arith.constant 0 : index
    %c32_83 = arith.constant 32 : index
    %65 = vector.load %arg10[%c0_82, %c32_83] : memref<64x72xf32, #tpu.memory_space<vmem>>, vector<64x8xf32>
    tpu.vector_store %arg10[%c0_82, %c32_83], %64 {strides = array<i32>} : memref<64x72xf32, #tpu.memory_space<vmem>>, vector<64x8xf32>,
    %c1_84 = arith.constant 1 : index
    %c2_85 = arith.constant 2 : index
    %c0_86 = arith.constant 0 : index
    %66 = vector.load %arg8[%c1_84, %c2_85, %c0_86] : memref<10x10x8xf32, #tpu.memory_space<vmem>>, vector<8x8x8xf32>
    %67 = vector.shape_cast %66 : vector<8x8x8xf32> to vector<64x8xf32>
    %c0_87 = arith.constant 0 : index
    %c40 = arith.constant 40 : index
    %68 = vector.load %arg10[%c0_87, %c40] : memref<64x72xf32, #tpu.memory_space<vmem>>, vector<64x8xf32>
    tpu.vector_store %arg10[%c0_87, %c40], %67 {strides = array<i32>} : memref<64x72xf32, #tpu.memory_space<vmem>>, vector<64x8xf32>,
    %c2_88 = arith.constant 2 : index
    %c0_89 = arith.constant 0 : index
    %c0_90 = arith.constant 0 : index
    %69 = vector.load %arg8[%c2_88, %c0_89, %c0_90] : memref<10x10x8xf32, #tpu.memory_space<vmem>>, vector<8x8x8xf32>
    %70 = vector.shape_cast %69 : vector<8x8x8xf32> to vector<64x8xf32>
    %c0_91 = arith.constant 0 : index
    %c48 = arith.constant 48 : index
    %71 = vector.load %arg10[%c0_91, %c48] : memref<64x72xf32, #tpu.memory_space<vmem>>, vector<64x8xf32>
    tpu.vector_store %arg10[%c0_91, %c48], %70 {strides = array<i32>} : memref<64x72xf32, #tpu.memory_space<vmem>>, vector<64x8xf32>,
    %c2_92 = arith.constant 2 : index
    %c1_93 = arith.constant 1 : index
    %c0_94 = arith.constant 0 : index
    %72 = vector.load %arg8[%c2_92, %c1_93, %c0_94] : memref<10x10x8xf32, #tpu.memory_space<vmem>>, vector<8x8x8xf32>
    %73 = vector.shape_cast %72 : vector<8x8x8xf32> to vector<64x8xf32>
    %c0_95 = arith.constant 0 : index
    %c56 = arith.constant 56 : index
    %74 = vector.load %arg10[%c0_95, %c56] : memref<64x72xf32, #tpu.memory_space<vmem>>, vector<64x8xf32>
    tpu.vector_store %arg10[%c0_95, %c56], %73 {strides = array<i32>} : memref<64x72xf32, #tpu.memory_space<vmem>>, vector<64x8xf32>,
    %c2_96 = arith.constant 2 : index
    %c2_97 = arith.constant 2 : index
    %c0_98 = arith.constant 0 : index
    %75 = vector.load %arg8[%c2_96, %c2_97, %c0_98] : memref<10x10x8xf32, #tpu.memory_space<vmem>>, vector<8x8x8xf32>
    %76 = vector.shape_cast %75 : vector<8x8x8xf32> to vector<64x8xf32>
    %c0_99 = arith.constant 0 : index
    %c64 = arith.constant 64 : index
    %77 = vector.load %arg10[%c0_99, %c64] : memref<64x72xf32, #tpu.memory_space<vmem>>, vector<64x8xf32>
    tpu.vector_store %arg10[%c0_99, %c64], %76 {strides = array<i32>} : memref<64x72xf32, #tpu.memory_space<vmem>>, vector<64x8xf32>,
    %c0_100 = arith.constant 0 : index
    %c0_101 = arith.constant 0 : index
    %78 = vector.load %arg10[%c0_100, %c0_101] : memref<64x72xf32, #tpu.memory_space<vmem>>, vector<64x72xf32>
    %c0_102 = arith.constant 0 : index
    %c0_103 = arith.constant 0 : index
    %79 = vector.load %arg4[%c0_102, %c0_103] : memref<72x8xf32, #tpu.memory_space<vmem>>, vector<72x8xf32>
    %cst_104 = arith.constant dense<0.000000e+00> : vector<64x8xf32>
    %80 = tpu.matmul %78, %79, %cst_104 {dimension_numbers = #tpu.dot_dimension_numbers<[1], [0], [0], [1], [0, 0, 1, 1], [], []>} : vector<64x72xf32>, vector<72x8xf32>, vector<64x8xf32> -> vector<64x8xf32>
    %c0_105 = arith.constant 0 : index
    %c0_106 = arith.constant 0 : index
    %81 = vector.load %arg5[%c0_105, %c0_106] : memref<1x8xf32, #tpu.memory_space<vmem>>, vector<1x8xf32>
    %82 = vector.broadcast %81 : vector<1x8xf32> to vector<64x8xf32>
    %83 = arith.addf %80, %82 : vector<64x8xf32>
    %cst_107 = arith.constant 0.000000e+00 : f32
    %84 = vector.broadcast %cst_107 : f32 to vector<64x8xf32>
    %85 = arith.maximumf %83, %84 : vector<64x8xf32>
    %86 = tpu.transpose %85, [1, 0] : vector<64x8xf32> -> vector<8x64xf32>
    %c0_108 = arith.constant 0 : index
    %c0_109 = arith.constant 0 : index
    %c0_110 = arith.constant 0 : index
    %87 = vector.load %arg6[%c0_108, %c0_109, %c0_110] : memref<1x8x64xf32, #tpu.memory_space<vmem>>, vector<1x8x64xf32>
    %88 = vector.shape_cast %87 : vector<1x8x64xf32> to vector<8x64xf32>
    %89 = vector.shape_cast %86 : vector<8x64xf32> to vector<1x8x64xf32>
    tpu.vector_store %arg6[%c0_108, %c0_109, %c0_110], %89 {strides = array<i32>} : memref<1x8x64xf32, #tpu.memory_space<vmem>>, vector<1x8x64xf32>,
    return
  }
  func.func @transform_0(%arg0: i32) -> (i32, i32, i32, i32) {
    %c0_i32 = arith.constant 0 : i32
    %c0_i32_0 = arith.constant 0 : i32
    %c0_i32_1 = arith.constant 0 : i32
    %c0_i32_2 = arith.constant 0 : i32
    return %arg0, %c0_i32, %c0_i32_0, %c0_i32_1 : i32, i32, i32, i32
  }
  func.func @transform_1(%arg0: i32) -> (i32, i32) {
    %c0_i32 = arith.constant 0 : i32
    %c0_i32_0 = arith.constant 0 : i32
    %c0_i32_1 = arith.constant 0 : i32
    return %c0_i32, %c0_i32_0 : i32, i32
  }
  func.func @transform_2(%arg0: i32) -> (i32, i32) {
    %c0_i32 = arith.constant 0 : i32
    %c0_i32_0 = arith.constant 0 : i32
    %c0_i32_1 = arith.constant 0 : i32
    return %c0_i32, %c0_i32_0 : i32, i32
  }
  func.func @transform_3(%arg0: i32) -> (i32, i32) {
    %c0_i32 = arith.constant 0 : i32
    %c0_i32_0 = arith.constant 0 : i32
    %c0_i32_1 = arith.constant 0 : i32
    return %c0_i32, %c0_i32_0 : i32, i32
  }
  func.func @transform_4(%arg0: i32) -> (i32, i32) {
    %c0_i32 = arith.constant 0 : i32
    %c0_i32_0 = arith.constant 0 : i32
    %c0_i32_1 = arith.constant 0 : i32
    return %c0_i32, %c0_i32_0 : i32, i32
  }
  func.func @transform_5(%arg0: i32) -> (i32, i32, i32) {
    %c0_i32 = arith.constant 0 : i32
    %c0_i32_0 = arith.constant 0 : i32
    %c0_i32_1 = arith.constant 0 : i32
    return %arg0, %c0_i32, %c0_i32_0 : i32, i32, i32
  }
}

</mosaic_0001>

<bundles_post_ra>
// kernel: down_forward.1
= control target key start
LH: loop header
LB: loop body
LE: loop exit
PB: predicated region body
PF: predicated region fallthrough
CT: control target
= control target key end

     0   :  { %s1814_s18 = smov 0   ;;  %s2305_s0 = inlined_call_operand.vmem [shape: f32[2,8,8,16], index: 0, kind: input, shape index: {}]   ;;  %s2306_s1 = inlined_call_operand.vmem [shape: f32[36,8], index: 1, kind: input, shape index: {}]   ;;  %s2307_s2 = inlined_call_operand.vmem [shape: f32[1,8], index: 2, kind: input, shape index: {}]   ;;  %s2308_s3 = inlined_call_operand.vmem [shape: f32[72,8], index: 3, kind: input, shape index: {}]   ;;  %s2309_s4 = inlined_call_operand.vmem [shape: f32[1,8], index: 4, kind: input, shape index: {}]   ;;  %s2310_s5 = inlined_call_operand.vmem [shape: f32[2,8,64], index: 5, kind: output, shape index: {}]  }
   0x1 LB: > { %s1602_s19 = sadd.s32 4294967295, %s1767_s18   ;;  %p1606_p0 = scmp.ge.s32.totalorder %s1767_s18, 1  ;;  %s1767_s18 = sphi %s1814_s18, %s15_s18  }
   0x2   : > { %p187_p1 = scmp.lt.s32.totalorder %s1767_s18, 3 }
   0x4   : > { %p188_p2 = pnand %p1606_p0, %p187_p1 }
   0x5   : > { %p1822_p3 = scmp.lt.s32.totalorder (!%p188_p2), %s1602_s19, 1  ;;  %vm311_vm0 = vcmask (!%p188_p2), 31744   ;;  %vm313_vm1 = vcmask (!%p188_p2), 25600   ;;  %v1769_v0 = vmov (!%p188_p2), 0.0   ;;  %s1770_s25 = smov (!%p188_p2), 124   ;;  %vm398_vm2 = vcmask (!%p188_p2), 64544  }
   0x6   : > { %191 = sbr.rel (%p188_p2) target bundleno = 1237 (0x4d5), region = 40  ;;  %312 = vst.msk [vmem:[#allocation2] sm:$0xff] (!%p188_p2), %vm311_vm0, %v1769_v0  ;;  %315 = vst.msk [vmem:[#allocation2 + $0x10] sm:$0xff] (!%p188_p2), %vm311_vm0, %v1769_v0  ;;  %s1771_s26 = smov (!%p188_p2), 4   ;;  %vm447_vm3 = vcmask (!%p188_p2), 97344   ;;  %v759_v63 = vld [vmem:[%s2306_s1] sm:$0xff] (!%p188_p2) }
   0x7   : > { %314 = vst.msk [vmem:[#allocation2 + $0x8] sm:$0x3] (!%p188_p2), %vm313_vm1, %v1769_v0  ;;  %316 = vst.msk [vmem:[#allocation2 + $0x18] sm:$0x3] (!%p188_p2), %vm313_vm1, %v1769_v0  ;;  %s1772_s27 = smov (!%p188_p2), 24   ;;  %s1773_s28 = smov (!%p188_p2), 8  }
   0x8   : > { %317 = vst.msk [vmem:[#allocation2 + $0x20] sm:$0xff] (!%p188_p2), %vm311_vm0, %v1769_v0  ;;  %319 = vst.msk [vmem:[#allocation2 + $0x30] sm:$0xff] (!%p188_p2), %vm311_vm0, %v1769_v0  ;;  %s1774_s29 = smov (!%p188_p2), 28   ;;  %s1775_s30 = smov (!%p188_p2), 120   ;;  %vm796_vm4 = vcmask (!%p188_p2), 1043456   ;;  %vm496_vm5 = vcmask (!%p188_p2), 130144  }
   0x9   : > { %318 = vst.msk [vmem:[#allocation2 + $0x28] sm:$0x3] (!%p188_p2), %vm313_vm1, %v1769_v0  ;;  %320 = vst.msk [vmem:[#allocation2 + $0x38] sm:$0x3] (!%p188_p2), %vm313_vm1, %v1769_v0  ;;  %s1776_s6 = smov (!%p188_p2), 12   ;;  %s1777_s7 = smov (!%p188_p2), 16  }
   0xa   : > { %321 = vst.msk [vmem:[#allocation2 + $0x40] sm:$0xff] (!%p188_p2), %vm311_vm0, %v1769_v0  ;;  %323 = vst.msk [vmem:[#allocation2 + $0x50] sm:$0xff] (!%p188_p2), %vm311_vm0, %v1769_v0  ;;  %s1778_s8 = smov (!%p188_p2), 20   ;;  %vm545_vm6 = vcmask (!%p188_p2), 162944   ;;  %vm594_vm7 = vcmask (!%p188_p2), 195744   ;;  %vm644_vm8 = vcmask (!%p188_p2), 228544  }
   0xb   : > { %322 = vst.msk [vmem:[#allocation2 + $0x48] sm:$0x3] (!%p188_p2), %vm313_vm1, %v1769_v0  ;;  %324 = vst.msk [vmem:[#allocation2 + $0x58] sm:$0x3] (!%p188_p2), %vm313_vm1, %v1769_v0  ;;  %vm693_vm9 = vcmask (!%p188_p2), 261344   ;;  %vm742_vm10 = vcmask (!%p188_p2), 294144  }
   0xc   : > { %325 = vst.msk [vmem:[#allocation2 + $0x60] sm:$0xff] (!%p188_p2), %vm311_vm0, %v1769_v0  ;;  %327 = vst.msk [vmem:[#allocation2 + $0x70] sm:$0xff] (!%p188_p2), %vm311_vm0, %v1769_v0  ;;  %vm771_vm11 = vcmask (!%p188_p2), 293888   ;;  %vm913_vm12 = vcmask (!%p188_p2), 64512   ;;  %vm915_vm13 = vcmask (!%p188_p2), 58368   ;;  %s1780_s22 = smov (!%p188_p2), 48  }
   0xd   : > { %326 = vst.msk [vmem:[#allocation2 + $0x68] sm:$0x3] %vm313_vm1, %v1769_v0  ;;  %328 = vst.msk [vmem:[#allocation2 + $0x78] sm:$0x3] %vm313_vm1, %v1769_v0  ;;  %s2313_s19 = smov (!%p1822_p3, %s1602_s19), 1  ;;  %v342_v7 = vld [vmem:[#allocation2] sm:$0xff] }
   0xe   : > { %329 = vst.msk [vmem:[#allocation2 + $0x80] sm:$0xff] %vm311_vm0, %v1769_v0  ;;  %331 = vst.msk [vmem:[#allocation2 + $0x90] sm:$0xff] %vm311_vm0, %v1769_v0  ;;  %s1631_s21 = sshll.u32 %s2313_s19, 6  ;;  %v358_v10 = vld [vmem:[#allocation2 + $0x1] sm:$0xff]  ;;  %s1781_s23 = smov 56   ;;  %vm1000_vm14 = vcmask 130112  }
   0xf   : > { %330 = vst.msk [vmem:[#allocation2 + $0x88] sm:$0x3] %vm313_vm1, %v1769_v0  ;;  %332 = vst.msk [vmem:[#allocation2 + $0x98] sm:$0x3] %vm313_vm1, %v1769_v0  ;;  %s218_s24 = scalar_lea.vmem %s2305_s0, %s1631_s21  ;;  %v407_v12 = vld [vmem:[#allocation2 + $0x2] sm:$0xff]  ;;  %s1779_s21 = smov 32  }
  0x10   : > { %v223_v1 = vld [vmem:[%s218_s24] sm:$0xff]  ;;  %v225_v2 = vld [vmem:[%s218_s24 + $0x10] sm:$0xff]  ;;  %v224_v3 = vld [vmem:[%s218_s24 + $0x8] sm:$0xff]  ;;  %350 = vst.msk [vmem:[#allocation4] sm:$0xff] %vm311_vm0, %v342_v7  ;;  %vm1049_vm15 = vcmask 195712   ;;  %vm1147_vm1 = vcmask 326912  }
  0x11   : > { %239 = vrot.lane.b32.xlu0 %v223_v1, %s1770_s25  ;;  %243 = vrot.lane.b32.xlu1 %v225_v2, %s1770_s25  ;;  %v226_v4 = vld [vmem:[%s218_s24 + $0x18] sm:$0xff]  ;;  %v227_v5 = vld [vmem:[%s218_s24 + $0x20] sm:$0xff]  ;;  %919 = vst.msk [vmem:[#allocation3 + $0x20] sm:$0xff] %vm913_vm12, %v1769_v0  ;;  %914 = vst.msk [vmem:[#allocation3] sm:$0xff] %vm913_vm12, %v1769_v0 }
  0x12   : > { %v228_v6 = vld [vmem:[%s218_s24 + $0x28] sm:$0xff]  ;;  %v229_v8 = vld [vmem:[%s218_s24 + $0x30] sm:$0xff]  ;;  %v230_v9 = vld [vmem:[%s218_s24 + $0x38] sm:$0xff]  ;;  %920 = vst.msk [vmem:[#allocation3 + $0x28] sm:$0x3] %vm915_vm13, %v1769_v0 }
  0x13   : > { %v763_v7 = vld [vmem:[%s2306_s1 + $0x20] sm:$0xf]  ;;  %916 = vst.msk [vmem:[#allocation3 + $0x8] sm:$0x3] %vm915_vm13, %v1769_v0  ;;  %918 = vst.msk [vmem:[#allocation3 + $0x18] sm:$0x3] %vm915_vm13, %v1769_v0 }
  0x14   : > { %917 = vst.msk [vmem:[#allocation3 + $0x10] sm:$0xff] %vm913_vm12, %v1769_v0  ;;  %921 = vst.msk [vmem:[#allocation3 + $0x30] sm:$0xff] %vm913_vm12, %v1769_v0 }
  0x15   : > { %241 = vrot.lane.b32.xlu0 %v224_v3, %s1770_s25  ;;  %245 = vrot.lane.b32.xlu1 %v226_v4, %s1770_s25  ;;  %v611_v11 = vld [vmem:[#allocation2 + $0x90] sm:$0xff]  ;;  %922 = vst.msk [vmem:[#allocation3 + $0x38] sm:$0x3] %vm915_vm13, %v1769_v0  ;;  %924 = vst.msk [vmem:[#allocation3 + $0x48] sm:$0x3] %vm915_vm13, %v1769_v0 }
  0x16   : > { %v660_v13 = vld [vmem:[#allocation2 + $0x91] sm:$0xff]  ;;  %923 = vst.msk [vmem:[#allocation3 + $0x40] sm:$0xff] %vm913_vm12, %v1769_v0  ;;  %925 = vst.msk [vmem:[#allocation3 + $0x50] sm:$0xff] %vm913_vm12, %v1769_v0 }
  0x17   : > { %926 = vst.msk [vmem:[#allocation3 + $0x58] sm:$0x3] %vm915_vm13, %v1769_v0  ;;  %928 = vst.msk [vmem:[#allocation3 + $0x68] sm:$0x3] %vm915_vm13, %v1769_v0 }
  0x18   : > { %927 = vst.msk [vmem:[#allocation3 + $0x60] sm:$0xff] %vm913_vm12, %v1769_v0  ;;  %929 = vst.msk [vmem:[#allocation3 + $0x70] sm:$0xff] %vm913_vm12, %v1769_v0 }
  0x19   : > { %247 = vrot.lane.b32.xlu0 %v227_v5, %s1770_s25  ;;  %249 = vrot.lane.b32.xlu1 %v228_v6, %s1770_s25  ;;  %930 = vst.msk [vmem:[#allocation3 + $0x78] sm:$0x3] %vm915_vm13, %v1769_v0  ;;  %932 = vst.msk [vmem:[#allocation3 + $0x88] sm:$0x3] %vm915_vm13, %v1769_v0 }
  0x1a   : > { %931 = vst.msk [vmem:[#allocation3 + $0x80] sm:$0xff] %vm913_vm12, %v1769_v0  ;;  %933 = vst.msk [vmem:[#allocation3 + $0x90] sm:$0xff] %vm913_vm12, %v1769_v0 }
  0x1b   : > { %934 = vst.msk [vmem:[#allocation3 + $0x98] sm:$0x3] %vm915_vm13, %v1769_v0 }
  0x1d   : > { %251 = vrot.lane.b32.xlu0 %v229_v8, %s1770_s25  ;;  %253 = vrot.lane.b32.xlu1 %v230_v9, %s1770_s25 }
  0x21   : > { %374 = vrot.lane.b32.xlu0 %v358_v10, %s1771_s26  ;;  %634 = vrot.lane.b32.xlu1 %v611_v11, %s1772_s27 }
  0x25   : > { %423 = vrot.lane.b32.xlu0 %v407_v12, %s1773_s28  ;;  %683 = vrot.lane.b32.xlu1 %v660_v13, %s1774_s29 }
  0x83   : > { %v240_v14 = vpop.permute.xlu0 %239  ;;  %v244_v15 = vpop.permute.xlu1 %243 }
  0x84   : > { %v263_v16 = vmax.f32 %v223_v1, %v240_v14  ;;  %v265_v17 = vmax.f32 %v225_v2, %v244_v15  ;;  %v760_v1 = vld [vmem:[%s2306_s1 + $0x8] sm:$0xff] }
  0x85   : > { %v1714_v2 = vpack.c.bf16 %v760_v1, %v759_v63 }
  0x86   : > { %279 = vrot.lane.b32.xlu0 %v263_v16, %s1775_s30 }
  0x87   : > { %v242_v18 = vpop.permute.xlu0 %241  ;;  %v246_v19 = vpop.permute.xlu1 %245  ;;  %1715 = vmatprep.subr.bf16.mxu0 %v1714_v2 }
  0x88   : > { %v264_v20 = vmax.f32 %v224_v3, %v242_v18  ;;  %v266_v21 = vmax.f32 %v226_v4, %v246_v19  ;;  %1717 = vmatpush3.bf16.msra.mxu0 %v1714_v2  ;;  %v761_v4 = vld [vmem:[%s2306_s1 + $0x10] sm:$0xff] }
  0x89   : > { %v709_v18 = vld [vmem:[#allocation2 + $0x92] sm:$0xff] }
  0x8a   : > { %283 = vrot.lane.b32.xlu0 %v265_v17, %s1775_s30  ;;  %281 = vrot.lane.b32.xlu1 %v264_v20, %s1775_s30 }
  0x8b   : > { %v248_v22 = vpop.permute.xlu0 %247  ;;  %v250_v23 = vpop.permute.xlu1 %249 }
  0x8c   : > { %v267_v24 = vmax.f32 %v227_v5, %v248_v22  ;;  %v268_v25 = vmax.f32 %v228_v6, %v250_v23  ;;  %v762_v5 = vld [vmem:[%s2306_s1 + $0x18] sm:$0xff] }
  0x8d   : > { %v1718_v6 = vpack.c.bf16 %v762_v5, %v761_v4 }
  0x8e   : > { %285 = vrot.lane.b32.xlu1 %v266_v21, %s1775_s30  ;;  %287 = vrot.lane.b32.xlu0 %v267_v24, %s1775_s30 }
  0x8f   : > { %v252_v26 = vpop.permute.xlu0 %251  ;;  %v254_v27 = vpop.permute.xlu1 %253  ;;  %1719 = vmatprep.subr.bf16.mxu0 %v1718_v6 }
  0x90   : > { %v269_v28 = vmax.f32 %v229_v8, %v252_v26  ;;  %v270_v29 = vmax.f32 %v230_v9, %v254_v27  ;;  %1721 = vmatpush3.bf16.msra.mxu0 %v1718_v6 }
  0x91   : > { %1670 = vmatprep.subr.msk.mxu0 %vm796_vm4, %v763_v7 }
  0x92   : > { %289 = vrot.lane.b32.xlu1 %v268_v25, %s1775_s30  ;;  %291 = vrot.lane.b32.xlu0 %v269_v28, %s1775_s30 }
  0x93   : > { %v375_v30 = vpop.permute.xlu0 %374  ;;  %v1881_v32 = vpop.permute.xlu1 %634 }
  0x94   : > { %399 = vst.msk [vmem:[#allocation4] sm:$0xff] %vm398_vm2, %v375_v30  ;;  %1671 = vmatpush3.msk.msra.mxu0 %vm796_vm4, %v763_v7  ;;  %vm1295_vm4 = vcmask 523712  }
  0x96   : > { %293 = vrot.lane.b32.xlu1 %v270_v29, %s1775_s30 }
  0x97   : > { %v424_v31 = vpop.permute.xlu0 %423  ;;  %v1883_v33 = vpop.permute.xlu1 %683 }
  0x98   : > { %448 = vst.msk [vmem:[#allocation4] sm:$0xff] %vm447_vm3, %v424_v31 }
  0xf8   : > { %v280_v34 = vpop.permute.xlu0 %279 }
  0xf9   : > { %v303_v35 = vmax.f32 %v263_v16, %v280_v34 }
  0xfb   : > { %334 = vst.msk [vmem:[#allocation2 + $0x11] sm:$0xff] %vm311_vm0, %v303_v35 }
  0xfc   : > { %v282_v36 = vpop.permute.xlu1 %281  ;;  %v284_v37 = vpop.permute.xlu0 %283 }
  0xfd   : > { %v304_v38 = vmax.f32 %v264_v20, %v282_v36  ;;  %v305_v39 = vmax.f32 %v265_v17, %v284_v37 }
  0xff   : > { %335 = vst.msk [vmem:[#allocation2 + $0x21] sm:$0xff] %vm311_vm0, %v304_v38  ;;  %336 = vst.msk [vmem:[#allocation2 + $0x31] sm:$0xff] %vm311_vm0, %v305_v39 }
 0x100   : > { %v286_v40 = vpop.permute.xlu1 %285  ;;  %v288_v41 = vpop.permute.xlu0 %287 }
 0x101   : > { %v306_v42 = vmax.f32 %v266_v21, %v286_v40  ;;  %v307_v43 = vmax.f32 %v267_v24, %v288_v41 }
 0x102   : > { %v456_v44 = vld [vmem:[#allocation2 + $0x10] sm:$0xff] }
 0x103   : > { %v359_v45 = vld [vmem:[#allocation2 + $0x11] sm:$0xff]  ;;  %337 = vst.msk [vmem:[#allocation2 + $0x41] sm:$0xff] %vm311_vm0, %v306_v42  ;;  %338 = vst.msk [vmem:[#allocation2 + $0x51] sm:$0xff] %vm311_vm0, %v307_v43  ;;  %472 = vrot.lane.b32.xlu0 %v456_v44, %s1776_s6 }
 0x104   : > { %376 = vrot.lane.b32.xlu1 %v359_v45, %s1771_s26  ;;  %351 = vst.msk [vmem:[#allocation4 + $0x8] sm:$0xff] %vm311_vm0, %v456_v44  ;;  %v290_v46 = vpop.permute.xlu1 %289  ;;  %v292_v47 = vpop.permute.xlu0 %291  ;;  %v408_v50 = vld [vmem:[#allocation2 + $0x12] sm:$0xff] }
 0x105   : > { %v308_v48 = vmax.f32 %v268_v25, %v290_v46  ;;  %v309_v49 = vmax.f32 %v269_v28, %v292_v47 }
 0x106   : > { %v457_v51 = vld [vmem:[#allocation2 + $0x20] sm:$0xff]  ;;  %v605_v52 = vld [vmem:[#allocation2 + $0x30] sm:$0xff] }
 0x107   : > { %339 = vst.msk [vmem:[#allocation2 + $0x61] sm:$0xff] %vm311_vm0, %v308_v48  ;;  %340 = vst.msk [vmem:[#allocation2 + $0x71] sm:$0xff] %vm311_vm0, %v309_v49  ;;  %521 = vrot.lane.b32.xlu0 %v359_v45, %s1777_s7  ;;  %v506_v55 = vld [vmem:[#allocation2 + $0x21] sm:$0xff]  ;;  %v361_v58 = vld [vmem:[#allocation2 + $0x31] sm:$0xff] }
 0x108   : > { %425 = vrot.lane.b32.xlu1 %v408_v50, %s1773_s28  ;;  %352 = vst.msk [vmem:[#allocation4 + $0x10] sm:$0xff] %vm311_vm0, %v457_v51  ;;  %v294_v53 = vpop.permute.xlu1 %293  ;;  %353 = vst.msk [vmem:[#allocation4 + $0x18] sm:$0xff] %vm311_vm0, %v605_v52  ;;  %v555_v61 = vld [vmem:[#allocation2 + $0x22] sm:$0xff]  ;;  %v410_v62 = vld [vmem:[#allocation2 + $0x32] sm:$0xff] }
 0x109   : > { %v310_v54 = vmax.f32 %v270_v29, %v294_v53 }
 0x10a   : > { %v459_v56 = vld [vmem:[#allocation2 + $0x40] sm:$0xff]  ;;  %v607_v57 = vld [vmem:[#allocation2 + $0x50] sm:$0xff] }
 0x10b   : > { %341 = vst.msk [vmem:[#allocation2 + $0x81] sm:$0xff] %vm311_vm0, %v310_v54  ;;  %523 = vrot.lane.b32.xlu0 %v506_v55, %s1777_s7  ;;  %354 = vst.msk [vmem:[#allocation4 + $0x20] sm:$0xff] %vm311_vm0, %v459_v56  ;;  %v362_v3 = vld [vmem:[#allocation2 + $0x41] sm:$0xff]  ;;  %v363_v8 = vld [vmem:[#allocation2 + $0x51] sm:$0xff] }
 0x10c   : > { %474 = vrot.lane.b32.xlu1 %v457_v51, %s1776_s6  ;;  %355 = vst.msk [vmem:[#allocation4 + $0x28] sm:$0xff] %vm311_vm0, %v607_v57  ;;  %v557_v9 = vld [vmem:[#allocation2 + $0x42] sm:$0xff]  ;;  %v412_v10 = vld [vmem:[#allocation2 + $0x52] sm:$0xff] }
 0x10e   : > { %v1904_v59 = vld [vmem:[#allocation2 + $0x60] sm:$0xff]  ;;  %v1908_v60 = vld [vmem:[#allocation2 + $0x70] sm:$0xff] }
 0x10f   : > { %380 = vrot.lane.b32.xlu0 %v361_v58, %s1771_s26  ;;  %356 = vst.msk [vmem:[#allocation4 + $0x30] sm:$0xff] %vm311_vm0, %v1904_v59  ;;  %357 = vst.msk [vmem:[#allocation4 + $0x38] sm:$0xff] %vm311_vm0, %v1908_v60  ;;  %v364_v11 = vld [vmem:[#allocation2 + $0x61] sm:$0xff]  ;;  %v365_v12 = vld [vmem:[#allocation2 + $0x71] sm:$0xff]  ;;  %vm1098_vm0 = vcmask 261312  }
 0x110   : > { %378 = vrot.lane.b32.xlu1 %v506_v55, %s1771_s26  ;;  %v559_v13 = vld [vmem:[#allocation2 + $0x62] sm:$0xff]  ;;  %v414_v14 = vld [vmem:[#allocation2 + $0x72] sm:$0xff] }
 0x112   : > { %v463_v15 = vld [vmem:[#allocation2 + $0x80] sm:$0xff] }
 0x113   : > { %572 = vrot.lane.b32.xlu0 %v555_v61, %s1778_s8  ;;  %v512_v16 = vld [vmem:[#allocation2 + $0x81] sm:$0xff] }
 0x114   : > { %570 = vrot.lane.b32.xlu1 %v408_v50, %s1778_s8  ;;  %v561_v17 = vld [vmem:[#allocation2 + $0x82] sm:$0xff] }
 0x117   : > { %429 = vrot.lane.b32.xlu0 %v410_v62, %s1773_s28 }
 0x118   : > { %427 = vrot.lane.b32.xlu1 %v555_v61, %s1773_s28 }
 0x11b   : > { %622 = vrot.lane.b32.xlu0 %v605_v52, %s1772_s27 }
 0x11c   : > { %620 = vrot.lane.b32.xlu1 %v457_v51, %s1772_s27 }
 0x11f   : > { %478 = vrot.lane.b32.xlu0 %v459_v56, %s1776_s6 }
 0x120   : > { %476 = vrot.lane.b32.xlu1 %v605_v52, %s1776_s6 }
 0x123   : > { %671 = vrot.lane.b32.xlu0 %v361_v58, %s1774_s29 }
 0x124   : > { %669 = vrot.lane.b32.xlu1 %v506_v55, %s1774_s29 }
 0x127   : > { %382 = vrot.lane.b32.xlu0 %v362_v3, %s1771_s26 }
 0x128   : > { %525 = vrot.lane.b32.xlu1 %v361_v58, %s1777_s7 }
 0x12b   : > { %574 = vrot.lane.b32.xlu0 %v410_v62, %s1778_s8 }
 0x12c   : > { %718 = vrot.lane.b32.xlu1 %v555_v61, %s1779_s21 }
 0x12f   : > { %384 = vrot.lane.b32.xlu0 %v363_v8, %s1771_s26 }
 0x130   : > { %527 = vrot.lane.b32.xlu1 %v362_v3, %s1777_s7 }
 0x133   : > { %576 = vrot.lane.b32.xlu0 %v557_v9, %s1778_s8 }
 0x134   : > { %720 = vrot.lane.b32.xlu1 %v410_v62, %s1779_s21 }
 0x137   : > { %433 = vrot.lane.b32.xlu0 %v412_v10, %s1773_s28 }
 0x138   : > { %431 = vrot.lane.b32.xlu1 %v557_v9, %s1773_s28 }
 0x13b   : > { %626 = vrot.lane.b32.xlu0 %v607_v57, %s1772_s27 }
 0x13c   : > { %624 = vrot.lane.b32.xlu1 %v459_v56, %s1772_s27 }
 0x13f   : > { %482 = vrot.lane.b32.xlu0 %v1904_v59, %s1776_s6 }
 0x140   : > { %480 = vrot.lane.b32.xlu1 %v607_v57, %s1776_s6 }
 0x143   : > { %675 = vrot.lane.b32.xlu0 %v363_v8, %s1774_s29 }
 0x144   : > { %673 = vrot.lane.b32.xlu1 %v362_v3, %s1774_s29 }
 0x147   : > { %386 = vrot.lane.b32.xlu0 %v364_v11, %s1771_s26 }
 0x148   : > { %529 = vrot.lane.b32.xlu1 %v363_v8, %s1777_s7 }
 0x14b   : > { %578 = vrot.lane.b32.xlu0 %v412_v10, %s1778_s8 }
 0x14c   : > { %722 = vrot.lane.b32.xlu1 %v557_v9, %s1779_s21 }
 0x14f   : > { %388 = vrot.lane.b32.xlu0 %v365_v12, %s1771_s26  ;;  %s1782_s26 = smov 40  }
 0x150   : > { %531 = vrot.lane.b32.xlu1 %v364_v11, %s1777_s7 }
 0x153   : > { %580 = vrot.lane.b32.xlu0 %v559_v13, %s1778_s8 }
 0x154   : > { %724 = vrot.lane.b32.xlu1 %v412_v10, %s1779_s21 }
 0x157   : > { %437 = vrot.lane.b32.xlu0 %v414_v14, %s1773_s28 }
 0x158   : > { %435 = vrot.lane.b32.xlu1 %v559_v13, %s1773_s28 }
 0x15b   : > { %630 = vrot.lane.b32.xlu0 %v1908_v60, %s1772_s27 }
 0x15c   : > { %628 = vrot.lane.b32.xlu1 %v1904_v59, %s1772_s27 }
 0x15f   : > { %486 = vrot.lane.b32.xlu0 %v463_v15, %s1776_s6 }
 0x160   : > { %484 = vrot.lane.b32.xlu1 %v1908_v60, %s1776_s6 }
 0x163   : > { %679 = vrot.lane.b32.xlu0 %v365_v12, %s1774_s29 }
 0x164   : > { %677 = vrot.lane.b32.xlu1 %v364_v11, %s1774_s29 }
 0x167   : > { %535 = vrot.lane.b32.xlu0 %v512_v16, %s1777_s7 }
 0x168   : > { %533 = vrot.lane.b32.xlu1 %v365_v12, %s1777_s7 }
 0x16b   : > { %728 = vrot.lane.b32.xlu0 %v414_v14, %s1779_s21 }
 0x16c   : > { %726 = vrot.lane.b32.xlu1 %v559_v13, %s1779_s21 }
 0x16f   : > { %632 = vrot.lane.b32.xlu0 %v463_v15, %s1772_s27 }
 0x170   : > { %582 = vrot.lane.b32.xlu1 %v414_v14, %s1778_s8 }
 0x173   : > { %681 = vrot.lane.b32.xlu0 %v512_v16, %s1774_s29  ;;  %s1783_s29 = smov 64  }
 0x174   : > { %584 = vrot.lane.b32.xlu1 %v561_v17, %s1778_s8 }
 0x175   : > { %v473_v20 = vpop.permute.xlu0 %472 }
 0x176   : > { %v377_v19 = vpop.permute.xlu1 %376  ;;  %497 = vst.msk [vmem:[#allocation4] sm:$0xff] %vm496_vm5, %v473_v20 }
 0x177   : > { %400 = vst.msk [vmem:[#allocation4 + $0x8] sm:$0xff] %vm398_vm2, %v377_v19  ;;  %730 = vrot.lane.b32.xlu0 %v561_v17, %s1779_s21 }
 0x178   : > { %732 = vrot.lane.b32.xlu1 %v709_v18, %s1779_s21 }
 0x179   : > { %v522_v22 = vpop.permute.xlu0 %521 }
 0x17a   : > { %v426_v21 = vpop.permute.xlu1 %425  ;;  %546 = vst.msk [vmem:[#allocation4] sm:$0xff] %vm545_vm6, %v522_v22 }
 0x17b   : > { %449 = vst.msk [vmem:[#allocation4 + $0x8] sm:$0xff] %vm447_vm3, %v426_v21 }
 0x17d   : > { %v524_v24 = vpop.permute.xlu0 %523 }
 0x17e   : > { %v475_v23 = vpop.permute.xlu1 %474 }
 0x17f   : > { %498 = vst.msk [vmem:[#allocation4 + $0x8] sm:$0xff] %vm496_vm5, %v475_v23 }
 0x180   : > { %547 = vst.msk [vmem:[#allocation4 + $0x8] sm:$0xff] %vm545_vm6, %v524_v24 }
 0x181   : > { %v381_v26 = vpop.permute.xlu0 %380 }
 0x182   : > { %v379_v25 = vpop.permute.xlu1 %378  ;;  %402 = vst.msk [vmem:[#allocation4 + $0x18] sm:$0xff] %vm398_vm2, %v381_v26  ;;  %v1262_v26 = vld [vmem:[#allocation3 + $0x91] sm:$0xff] }
 0x183   : > { %401 = vst.msk [vmem:[#allocation4 + $0x10] sm:$0xff] %vm398_vm2, %v379_v25 }
 0x185   : > { %v573_v28 = vpop.permute.xlu0 %572 }
 0x186   : > { %v571_v27 = vpop.permute.xlu1 %570  ;;  %596 = vst.msk [vmem:[#allocation4 + $0x8] sm:$0xff] %vm594_vm7, %v573_v28  ;;  %v944_v28 = vld [vmem:[#allocation3] sm:$0xff] }
 0x187   : > { %595 = vst.msk [vmem:[#allocation4] sm:$0xff] %vm594_vm7, %v571_v27  ;;  %v1009_v27 = vld [vmem:[#allocation3 + $0x2] sm:$0xff] }
 0x188   : > { %952 = vst.msk [vmem:[#allocation5] sm:$0xff] %vm913_vm12, %v944_v28 }
 0x189   : > { %v430_v30 = vpop.permute.xlu0 %429 }
 0x18a   : > { %v428_v29 = vpop.permute.xlu1 %427  ;;  %451 = vst.msk [vmem:[#allocation4 + $0x18] sm:$0xff] %vm447_vm3, %v430_v30  ;;  %v2107_v30 = vld [vmem:[%s2307_s2] ss:$0 sm:$0xff] }
 0x18b   : > { %450 = vst.msk [vmem:[#allocation4 + $0x10] sm:$0xff] %vm447_vm3, %v428_v29 }
 0x18d   : > { %v623_v34 = vpop.permute.xlu0 %622 }
 0x18e   : > { %v621_v31 = vpop.permute.xlu1 %620  ;;  %646 = vst.msk [vmem:[#allocation4 + $0x8] sm:$0xff] %vm644_vm8, %v623_v34 }
 0x18f   : > { %645 = vst.msk [vmem:[#allocation4] sm:$0xff] %vm644_vm8, %v621_v31 }
 0x191   : > { %v479_v36 = vpop.permute.xlu0 %478 }
 0x192   : > { %v477_v35 = vpop.permute.xlu1 %476  ;;  %500 = vst.msk [vmem:[#allocation4 + $0x18] sm:$0xff] %vm496_vm5, %v479_v36 }
 0x193   : > { %499 = vst.msk [vmem:[#allocation4 + $0x10] sm:$0xff] %vm496_vm5, %v477_v35 }
 0x195   : > { %v672_v38 = vpop.permute.xlu0 %671 }
 0x196   : > { %v670_v37 = vpop.permute.xlu1 %669  ;;  %695 = vst.msk [vmem:[#allocation4 + $0x8] sm:$0xff] %vm693_vm9, %v672_v38 }
 0x197   : > { %694 = vst.msk [vmem:[#allocation4] sm:$0xff] %vm693_vm9, %v670_v37 }
 0x199   : > { %v383_v40 = vpop.permute.xlu0 %382 }
 0x19a   : > { %v526_v39 = vpop.permute.xlu1 %525  ;;  %403 = vst.msk [vmem:[#allocation4 + $0x20] sm:$0xff] %vm398_vm2, %v383_v40 }
 0x19b   : > { %548 = vst.msk [vmem:[#allocation4 + $0x10] sm:$0xff] %vm545_vm6, %v526_v39 }
 0x19d   : > { %v575_v42 = vpop.permute.xlu0 %574 }
 0x19e   : > { %v719_v41 = vpop.permute.xlu1 %718  ;;  %597 = vst.msk [vmem:[#allocation4 + $0x10] sm:$0xff] %vm594_vm7, %v575_v42 }
 0x19f   : > { %743 = vst.msk [vmem:[#allocation4] sm:$0xff] %vm742_vm10, %v719_v41 }
 0x1a1   : > { %v385_v44 = vpop.permute.xlu0 %384 }
 0x1a2   : > { %v528_v43 = vpop.permute.xlu1 %527  ;;  %404 = vst.msk [vmem:[#allocation4 + $0x28] sm:$0xff] %vm398_vm2, %v385_v44 }
 0x1a3   : > { %549 = vst.msk [vmem:[#allocation4 + $0x18] sm:$0xff] %vm545_vm6, %v528_v43 }
 0x1a5   : > { %v577_v46 = vpop.permute.xlu0 %576 }
 0x1a6   : > { %v721_v45 = vpop.permute.xlu1 %720  ;;  %v751_v47 = vld [vmem:[#allocation4] sm:$0xff]  ;;  %598 = vst.msk [vmem:[#allocation4 + $0x18] sm:$0xff] %vm594_vm7, %v577_v46 }
 0x1a7   : > { %744 = vst.msk [vmem:[#allocation4 + $0x8] sm:$0xff] %vm742_vm10, %v721_v45  ;;  %1672 = vmatprep.mubr.msk.f32.mxu0 %vm771_vm11, %v751_v47 }
 0x1a9   : > { %v434_v49 = vpop.permute.xlu0 %433 }
 0x1aa   : > { %v432_v48 = vpop.permute.xlu1 %431  ;;  %453 = vst.msk [vmem:[#allocation4 + $0x28] sm:$0xff] %vm447_vm3, %v434_v49 }
 0x1ab   : > { %452 = vst.msk [vmem:[#allocation4 + $0x20] sm:$0xff] %vm447_vm3, %v432_v48 }
 0x1ad   : > { %v627_v51 = vpop.permute.xlu0 %626 }
 0x1ae   : > { %v625_v50 = vpop.permute.xlu1 %624  ;;  %v752_v52 = vld [vmem:[#allocation4 + $0x8] sm:$0xff]  ;;  %648 = vst.msk [vmem:[#allocation4 + $0x18] sm:$0xff] %vm644_vm8, %v627_v51 }
 0x1af   : > { %647 = vst.msk [vmem:[#allocation4 + $0x10] sm:$0xff] %vm644_vm8, %v625_v50  ;;  %1673 = vmatmul.mubr.msk.f32.vlgmr.msra.gmra.mrb[0].mxu0 %vm771_vm11, %v752_v52 }
 0x1b1   : > { %v483_v54 = vpop.permute.xlu0 %482 }
 0x1b2   : > { %v481_v53 = vpop.permute.xlu1 %480  ;;  %502 = vst.msk [vmem:[#allocation4 + $0x28] sm:$0xff] %vm496_vm5, %v483_v54 }
 0x1b3   : > { %501 = vst.msk [vmem:[#allocation4 + $0x20] sm:$0xff] %vm496_vm5, %v481_v53 }
 0x1b5   : > { %v676_v56 = vpop.permute.xlu0 %675 }
 0x1b6   : > { %v674_v55 = vpop.permute.xlu1 %673  ;;  %697 = vst.msk [vmem:[#allocation4 + $0x18] sm:$0xff] %vm693_vm9, %v676_v56  ;;  %v1362_v56 = vld [vmem:[%s2308_s3 + $0x8] sm:$0xff] }
 0x1b7   : > { %696 = vst.msk [vmem:[#allocation4 + $0x10] sm:$0xff] %vm693_vm9, %v674_v55  ;;  %v1361_v55 = vld [vmem:[%s2308_s3] sm:$0xff] }
 0x1b9   : > { %v387_v58 = vpop.permute.xlu0 %386 }
 0x1ba   : > { %v530_v57 = vpop.permute.xlu1 %529  ;;  %405 = vst.msk [vmem:[#allocation4 + $0x30] sm:$0xff] %vm398_vm2, %v387_v58 }
 0x1bb   : > { %550 = vst.msk [vmem:[#allocation4 + $0x20] sm:$0xff] %vm545_vm6, %v530_v57  ;;  %v1722_v57 = vpack.c.bf16 %v1362_v56, %v1361_v55 }
 0x1bd   : > { %v579_v60 = vpop.permute.xlu0 %578  ;;  %1723 = vmatprep.subr.bf16.mxu1 %v1722_v57 }
 0x1be   : > { %v723_v59 = vpop.permute.xlu1 %722  ;;  %599 = vst.msk [vmem:[#allocation4 + $0x20] sm:$0xff] %vm594_vm7, %v579_v60  ;;  %1725 = vmatpush3.bf16.msra.mxu1 %v1722_v57  ;;  %v1364_v60 = vld [vmem:[%s2308_s3 + $0x18] sm:$0xff] }
 0x1bf   : > { %745 = vst.msk [vmem:[#allocation4 + $0x10] sm:$0xff] %vm742_vm10, %v723_v59  ;;  %v1363_v59 = vld [vmem:[%s2308_s3 + $0x10] sm:$0xff] }
 0x1c1   : > { %v389_v62 = vpop.permute.xlu0 %388 }
 0x1c2   : > { %v532_v61 = vpop.permute.xlu1 %531  ;;  %406 = vst.msk [vmem:[#allocation4 + $0x38] sm:$0xff] %vm398_vm2, %v389_v62  ;;  %v1726_v62 = vpack.c.bf16 %v1364_v60, %v1363_v59  ;;  %vm1196_vm2 = vcmask 392512  }
 0x1c3   : > { %551 = vst.msk [vmem:[#allocation4 + $0x28] sm:$0xff] %vm545_vm6, %v532_v61 }
 0x1c4   : > { %1727 = vmatprep.subr.bf16.mxu1 %v1726_v62 }
 0x1c5   : > { %v581_v1 = vpop.permute.xlu0 %580  ;;  %1729 = vmatpush3.bf16.msra.mxu1 %v1726_v62 }
 0x1c6   : > { %v725_v63 = vpop.permute.xlu1 %724  ;;  %v753_v2 = vld [vmem:[#allocation4 + $0x10] sm:$0xff]  ;;  %600 = vst.msk [vmem:[#allocation4 + $0x28] sm:$0xff] %vm594_vm7, %v581_v1 }
 0x1c7   : > { %746 = vst.msk [vmem:[#allocation4 + $0x18] sm:$0xff] %vm742_vm10, %v725_v63  ;;  %1675 = vmatprep.mubr.msk.f32.mxu0 %vm771_vm11, %v753_v2 }
 0x1c9   : > { %v438_v4 = vpop.permute.xlu0 %437 }
 0x1ca   : > { %v436_v3 = vpop.permute.xlu1 %435  ;;  %455 = vst.msk [vmem:[#allocation4 + $0x38] sm:$0xff] %vm447_vm3, %v438_v4 }
 0x1cb   : > { %454 = vst.msk [vmem:[#allocation4 + $0x30] sm:$0xff] %vm447_vm3, %v436_v3  ;;  %vm1246_vm3 = vcmask 458112  }
 0x1cd   : > { %v631_v6 = vpop.permute.xlu0 %630 }
 0x1ce   : > { %v629_v5 = vpop.permute.xlu1 %628  ;;  %v754_v7 = vld [vmem:[#allocation4 + $0x18] sm:$0xff]  ;;  %650 = vst.msk [vmem:[#allocation4 + $0x28] sm:$0xff] %vm644_vm8, %v631_v6  ;;  %v1366_v6 = vld [vmem:[%s2308_s3 + $0x28] sm:$0xff] }
 0x1cf   : > { %649 = vst.msk [vmem:[#allocation4 + $0x20] sm:$0xff] %vm644_vm8, %v629_v5  ;;  %1676 = vmatmul.mubr.msk.f32.gmra.mrb[2].mxu0 %vm771_vm11, %v754_v7  ;;  %v1365_v5 = vld [vmem:[%s2308_s3 + $0x20] sm:$0xff] }
 0x1d1   : > { %v487_v9 = vpop.permute.xlu0 %486 }
 0x1d2   : > { %v485_v8 = vpop.permute.xlu1 %484  ;;  %504 = vst.msk [vmem:[#allocation4 + $0x38] sm:$0xff] %vm496_vm5, %v487_v9  ;;  %v1367_v9 = vld [vmem:[%s2308_s3 + $0x30] sm:$0xff] }
 0x1d3   : > { %503 = vst.msk [vmem:[#allocation4 + $0x30] sm:$0xff] %vm496_vm5, %v485_v8  ;;  %v1730_v8 = vpack.c.bf16 %v1366_v6, %v1365_v5  ;;  %vm1344_vm5 = vcmask 589312  }
 0x1d5   : > { %v680_v11 = vpop.permute.xlu0 %679  ;;  %1731 = vmatprep.subr.bf16.mxu1 %v1730_v8 }
 0x1d6   : > { %v678_v10 = vpop.permute.xlu1 %677  ;;  %699 = vst.msk [vmem:[#allocation4 + $0x28] sm:$0xff] %vm693_vm9, %v680_v11  ;;  %1733 = vmatpush3.bf16.msra.mxu1 %v1730_v8 }
 0x1d7   : > { %698 = vst.msk [vmem:[#allocation4 + $0x20] sm:$0xff] %vm693_vm9, %v678_v10  ;;  %v1368_v10 = vld [vmem:[%s2308_s3 + $0x38] sm:$0xff] }
 0x1d8   : > { %v1734_v11 = vpack.c.bf16 %v1368_v10, %v1367_v9 }
 0x1d9   : > { %v536_v13 = vpop.permute.xlu0 %535 }
 0x1da   : > { %v534_v12 = vpop.permute.xlu1 %533  ;;  %553 = vst.msk [vmem:[#allocation4 + $0x38] sm:$0xff] %vm545_vm6, %v536_v13  ;;  %1735 = vmatprep.subr.bf16.mxu1 %v1734_v11 }
 0x1db   : > { %552 = vst.msk [vmem:[#allocation4 + $0x30] sm:$0xff] %vm545_vm6, %v534_v12  ;;  %1737 = vmatpush3.bf16.msra.mxu1 %v1734_v11  ;;  %v1369_v12 = vld [vmem:[%s2308_s3 + $0x40] sm:$0xff]  ;;  %vm1377_vm6 = vcmask 588800  }
 0x1dc   : > { %1700 = vmatprep.subr.mxu1 %v1369_v12 }
 0x1dd   : > { %v729_v15 = vpop.permute.xlu0 %728 }
 0x1de   : > { %v727_v14 = vpop.permute.xlu1 %726  ;;  %748 = vst.msk [vmem:[#allocation4 + $0x28] sm:$0xff] %vm742_vm10, %v729_v15 }
 0x1df   : > { %747 = vst.msk [vmem:[#allocation4 + $0x20] sm:$0xff] %vm742_vm10, %v727_v14  ;;  %1701 = vmatpush3.msra.mxu1 %v1369_v12 }
 0x1e1   : > { %v633_v17 = vpop.permute.xlu0 %632 }
 0x1e2   : > { %v583_v16 = vpop.permute.xlu1 %582 }
 0x1e3   : > { %601 = vst.msk [vmem:[#allocation4 + $0x30] sm:$0xff] %vm594_vm7, %v583_v16 }
 0x1e4   : > { %651 = vst.msk [vmem:[#allocation4 + $0x30] sm:$0xff] %vm644_vm8, %v633_v17 }
 0x1e5   : > { %v682_v19 = vpop.permute.xlu0 %681  ;;  %v756_v21 = vld [vmem:[#allocation4 + $0x28] sm:$0xff] }
 0x1e6   : > { %v585_v18 = vpop.permute.xlu1 %584  ;;  %v755_v20 = vld [vmem:[#allocation4 + $0x20] sm:$0xff]  ;;  %700 = vst.msk [vmem:[#allocation4 + $0x30] sm:$0xff] %vm693_vm9, %v682_v19 }
 0x1e7   : > { %602 = vst.msk [vmem:[#allocation4 + $0x38] sm:$0xff] %vm594_vm7, %v585_v18  ;;  %1678 = vmatprep.mubr.msk.f32.mxu0 %vm771_vm11, %v755_v20  ;;  %vm1547_vm7 = vcmask 523264  }
 0x1e8   : > { %652 = vst.msk [vmem:[#allocation4 + $0x38] sm:$0xff] %vm644_vm8, %v1881_v32  ;;  %1679 = vmatmul.mubr.msk.f32.gmra.mrb[4].mxu0 %vm771_vm11, %v756_v21  ;;  %v1213_v32 = vld [vmem:[#allocation3 + $0x90] sm:$0xff] }
 0x1e9   : > { %701 = vst.msk [vmem:[#allocation4 + $0x38] sm:$0xff] %vm693_vm9, %v1883_v33  ;;  %v731_v22 = vpop.permute.xlu0 %730  ;;  %v960_v33 = vld [vmem:[#allocation3 + $0x1] sm:$0xff]  ;;  %1236 = vrot.lane.b32.xlu1 %v1213_v32, %s1780_s22 }
 0x1ea   : > { %v733_v23 = vpop.permute.xlu1 %732  ;;  %749 = vst.msk [vmem:[#allocation4 + $0x30] sm:$0xff] %vm742_vm10, %v731_v22  ;;  %976 = vrot.lane.b32.xlu0 %v960_v33, %s1773_s28 }
 0x1eb   : > { %750 = vst.msk [vmem:[#allocation4 + $0x38] sm:$0xff] %vm742_vm10, %v733_v23 }
 0x1ed   : > { %1285 = vrot.lane.b32.xlu1 %v1262_v26, %s1781_s23 }
 0x1ee   : > { %1025 = vrot.lane.b32.xlu0 %v1009_v27, %s1777_s7 }
 0x1f1   : > { %v757_v24 = vld [vmem:[#allocation4 + $0x30] sm:$0xff] }
 0x1f2   : > { %v758_v25 = vld [vmem:[#allocation4 + $0x38] sm:$0xff]  ;;  %1681 = vmatprep.mubr.msk.f32.mxu0 %vm771_vm11, %v757_v24 }
 0x1f3   : > { %1682 = vmatmul.mubr.msk.f32.gmra.mrb[6].mxu0 %vm771_vm11, %v758_v25 }
 0x25b   : > { %v2207_v27 = vpop.permute.xlu1 %1236 }
 0x25c   : > { %v977_v29 = vpop.permute.xlu0 %976 }
 0x25d   : > { %1001 = vst.msk [vmem:[#allocation5] sm:$0xff] %vm1000_vm14, %v977_v29 }
 0x25f   : > { %v2213_v29 = vpop.permute.xlu1 %1285 }
 0x260   : > { %v1026_v0 = vpop.permute.xlu0 %1025 }
 0x261   : > { %1050 = vst.msk [vmem:[#allocation5] sm:$0xff] %vm1049_vm15, %v1026_v0 }
 0x282   : > { %v1674_v31 = vpop.f32.mrb[0].mxu0 }
 0x283   : > { %v872_v34 = vadd.f32 %v1674_v31, %v2107_v30  ;;  %v866_v35 = vpop.f32.mrb[1].mxu0 }
 0x284   : > { %v867_v36 = vadd.f32 %v2107_v30, %v866_v35 }
 0x285   : > { %v906_v37 = vmax.f32 %v872_v34, 0.0 }
 0x286   : > { %v905_v38 = vmax.f32 %v867_v36, 0.0 }
 0x287   : > { %937 = vst.msk [vmem:[#allocation3 + $0x21] sm:$0xff] %vm913_vm12, %v906_v37 }
 0x288   : > { %936 = vst.msk [vmem:[#allocation3 + $0x11] sm:$0xff] %vm913_vm12, %v905_v38 }
 0x28e   : > { %v1108_v39 = vld [vmem:[#allocation3 + $0x21] sm:$0xff] }
 0x28f   : > { %v1059_v40 = vld [vmem:[#allocation3 + $0x20] sm:$0xff]  ;;  %1125 = vrot.lane.b32.xlu0 %v1108_v39, %s1779_s21  ;;  %v1058_v41 = vld [vmem:[#allocation3 + $0x10] sm:$0xff] }
 0x290   : > { %1076 = vrot.lane.b32.xlu1 %v1059_v40, %s1772_s27  ;;  %954 = vst.msk [vmem:[#allocation5 + $0x10] sm:$0xff] %vm913_vm12, %v1059_v40  ;;  %953 = vst.msk [vmem:[#allocation5 + $0x8] sm:$0xff] %vm913_vm12, %v1058_v41  ;;  %v1157_v42 = vld [vmem:[#allocation3 + $0x22] sm:$0xff]  ;;  %v1107_v43 = vld [vmem:[#allocation3 + $0x11] sm:$0xff] }
 0x291   : > { %v1010_v50 = vld [vmem:[#allocation3 + $0x12] sm:$0xff] }
 0x293   : > { %1174 = vrot.lane.b32.xlu0 %v1157_v42, %s1782_s26 }
 0x294   : > { %980 = vrot.lane.b32.xlu1 %v1108_v39, %s1773_s28 }
 0x297   : > { %1074 = vrot.lane.b32.xlu0 %v1058_v41, %s1772_s27 }
 0x298   : > { %1029 = vrot.lane.b32.xlu1 %v1157_v42, %s1777_s7 }
 0x29b   : > { %1123 = vrot.lane.b32.xlu0 %v1107_v43, %s1779_s21 }
 0x29c   : > { %1222 = vrot.lane.b32.xlu1 %v1059_v40, %s1780_s22 }
 0x2a0   : > { %1271 = vrot.lane.b32.xlu1 %v1108_v39, %s1781_s23 }
 0x2a2   : > { %v1677_v44 = vpop.f32.mrb[2].mxu0 }
 0x2a3   : > { %v882_v45 = vadd.f32 %v1677_v44, %v2107_v30  ;;  %v876_v46 = vpop.f32.mrb[3].mxu0 }
 0x2a4   : > { %1320 = vrot.lane.b32.xlu1 %v1157_v42, %s1783_s29  ;;  %v877_v47 = vadd.f32 %v2107_v30, %v876_v46 }
 0x2a5   : > { %v908_v48 = vmax.f32 %v882_v45, 0.0 }
 0x2a6   : > { %v907_v49 = vmax.f32 %v877_v47, 0.0 }
 0x2a7   : > { %939 = vst.msk [vmem:[#allocation3 + $0x41] sm:$0xff] %vm913_vm12, %v908_v48 }
 0x2a8   : > { %978 = vrot.lane.b32.xlu1 %v1107_v43, %s1773_s28  ;;  %938 = vst.msk [vmem:[#allocation3 + $0x31] sm:$0xff] %vm913_vm12, %v907_v49 }
 0x2ac   : > { %1027 = vrot.lane.b32.xlu1 %v1010_v50, %s1777_s7 }
 0x2ae   : > { %v1061_v51 = vld [vmem:[#allocation3 + $0x40] sm:$0xff] }
 0x2af   : > { %1080 = vrot.lane.b32.xlu0 %v1061_v51, %s1772_s27  ;;  %v1207_v52 = vld [vmem:[#allocation3 + $0x30] sm:$0xff]  ;;  %956 = vst.msk [vmem:[#allocation5 + $0x20] sm:$0xff] %vm913_vm12, %v1061_v51  ;;  %v1110_v53 = vld [vmem:[#allocation3 + $0x41] sm:$0xff] }
 0x2b0   : > { %1172 = vrot.lane.b32.xlu1 %v1010_v50, %s1782_s26  ;;  %955 = vst.msk [vmem:[#allocation5 + $0x18] sm:$0xff] %vm913_vm12, %v1207_v52  ;;  %v1013_v54 = vld [vmem:[#allocation3 + $0x42] sm:$0xff]  ;;  %v963_v58 = vld [vmem:[#allocation3 + $0x31] sm:$0xff] }
 0x2b1   : > { %v1012_v4 = vld [vmem:[#allocation3 + $0x32] sm:$0xff] }
 0x2b3   : > { %984 = vrot.lane.b32.xlu0 %v1110_v53, %s1773_s28 }
 0x2b4   : > { %1129 = vrot.lane.b32.xlu1 %v1110_v53, %s1779_s21 }
 0x2b7   : > { %1178 = vrot.lane.b32.xlu0 %v1013_v54, %s1782_s26 }
 0x2b8   : > { %1033 = vrot.lane.b32.xlu1 %v1013_v54, %s1777_s7 }
 0x2bb   : > { %982 = vrot.lane.b32.xlu0 %v963_v58, %s1773_s28  ;;  %v1680_v61 = vpop.f32.mrb[4].mxu0 }
 0x2bc   : > { %1226 = vrot.lane.b32.xlu1 %v1061_v51, %s1780_s22  ;;  %v892_v63 = vadd.f32 %v1680_v61, %v2107_v30  ;;  %v886_v1 = vpop.f32.mrb[5].mxu0 }
 0x2bd   : > { %v887_v2 = vadd.f32 %v2107_v30, %v886_v1 }
 0x2be   : > { %v910_v3 = vmax.f32 %v892_v63, 0.0 }
 0x2bf   : > { %v909_v7 = vmax.f32 %v887_v2, 0.0  ;;  %1031 = vrot.lane.b32.xlu0 %v1012_v4, %s1777_s7 }
 0x2c0   : > { %1275 = vrot.lane.b32.xlu1 %v1110_v53, %s1781_s23  ;;  %941 = vst.msk [vmem:[#allocation3 + $0x61] sm:$0xff] %vm913_vm12, %v910_v3 }
 0x2c1   : > { %940 = vst.msk [vmem:[#allocation3 + $0x51] sm:$0xff] %vm913_vm12, %v909_v7 }
 0x2c3   : > { %1224 = vrot.lane.b32.xlu0 %v1207_v52, %s1780_s22 }
 0x2c4   : > { %1324 = vrot.lane.b32.xlu1 %v1013_v54, %s1783_s29 }
 0x2c6   : > { %v1683_v14 = vpop.f32.mrb[6].mxu0 }
 0x2c7   : > { %1273 = vrot.lane.b32.xlu0 %v963_v58, %s1781_s23  ;;  %v1063_v13 = vld [vmem:[#allocation3 + $0x60] sm:$0xff]  ;;  %v902_v15 = vadd.f32 %v1683_v14, %v2107_v30  ;;  %v896_v16 = vpop.f32.mrb[7].mxu0 }
 0x2c8   : > { %1078 = vrot.lane.b32.xlu1 %v1207_v52, %s1772_s27  ;;  %v1209_v17 = vld [vmem:[#allocation3 + $0x50] sm:$0xff]  ;;  %958 = vst.msk [vmem:[#allocation5 + $0x30] sm:$0xff] %vm913_vm12, %v1063_v13  ;;  %v897_v18 = vadd.f32 %v2107_v30, %v896_v16  ;;  %v1112_v21 = vld [vmem:[#allocation3 + $0x61] sm:$0xff] }
 0x2c9   : > { %957 = vst.msk [vmem:[#allocation5 + $0x28] sm:$0xff] %vm913_vm12, %v1209_v17  ;;  %v912_v19 = vmax.f32 %v902_v15, 0.0  ;;  %v1015_v23 = vld [vmem:[#allocation3 + $0x62] sm:$0xff]  ;;  %v965_v24 = vld [vmem:[#allocation3 + $0x51] sm:$0xff] }
 0x2ca   : > { %v911_v20 = vmax.f32 %v897_v18, 0.0  ;;  %v1014_v25 = vld [vmem:[#allocation3 + $0x52] sm:$0xff] }
 0x2cb   : > { %1176 = vrot.lane.b32.xlu0 %v1012_v4, %s1782_s26  ;;  %943 = vst.msk [vmem:[#allocation3 + $0x81] sm:$0xff] %vm913_vm12, %v912_v19  ;;  %v1311_v30 = vld [vmem:[#allocation3 + $0x92] sm:$0xff] }
 0x2cc   : > { %1127 = vrot.lane.b32.xlu1 %v963_v58, %s1779_s21  ;;  %942 = vst.msk [vmem:[#allocation3 + $0x71] sm:$0xff] %vm913_vm12, %v911_v20 }
 0x2cf   : > { %1084 = vrot.lane.b32.xlu0 %v1063_v13, %s1772_s27 }
 0x2d0   : > { %1322 = vrot.lane.b32.xlu1 %v1012_v4, %s1783_s29 }
 0x2d2   : > { %v1065_v32 = vld [vmem:[#allocation3 + $0x80] sm:$0xff] }
 0x2d3   : > { %988 = vrot.lane.b32.xlu0 %v1112_v21, %s1773_s28  ;;  %v1064_v22 = vld [vmem:[#allocation3 + $0x70] sm:$0xff]  ;;  %v1163_v33 = vld [vmem:[#allocation3 + $0x82] sm:$0xff] }
 0x2d4   : > { %1133 = vrot.lane.b32.xlu1 %v1112_v21, %s1779_s21  ;;  %959 = vst.msk [vmem:[#allocation5 + $0x38] sm:$0xff] %vm913_vm12, %v1064_v22  ;;  %v1114_v26 = vld [vmem:[#allocation3 + $0x81] sm:$0xff]  ;;  %v1113_v28 = vld [vmem:[#allocation3 + $0x71] sm:$0xff] }
 0x2d5   : > { %v1162_v0 = vld [vmem:[#allocation3 + $0x72] sm:$0xff] }
 0x2d7   : > { %1182 = vrot.lane.b32.xlu0 %v1015_v23, %s1782_s26 }
 0x2d8   : > { %1037 = vrot.lane.b32.xlu1 %v1015_v23, %s1777_s7 }
 0x2db   : > { %986 = vrot.lane.b32.xlu0 %v965_v24, %s1773_s28 }
 0x2dc   : > { %1230 = vrot.lane.b32.xlu1 %v1063_v13, %s1780_s22 }
 0x2df   : > { %1035 = vrot.lane.b32.xlu0 %v1014_v25, %s1777_s7 }
 0x2e0   : > { %1279 = vrot.lane.b32.xlu1 %v1112_v21, %s1781_s23 }
 0x2e3   : > { %1228 = vrot.lane.b32.xlu0 %v1209_v17, %s1780_s22 }
 0x2e4   : > { %1328 = vrot.lane.b32.xlu1 %v1015_v23, %s1783_s29 }
 0x2e7   : > { %1277 = vrot.lane.b32.xlu0 %v965_v24, %s1781_s23 }
 0x2e8   : > { %1082 = vrot.lane.b32.xlu1 %v1209_v17, %s1772_s27 }
 0x2eb   : > { %1180 = vrot.lane.b32.xlu0 %v1014_v25, %s1782_s26 }
 0x2ec   : > { %1131 = vrot.lane.b32.xlu1 %v965_v24, %s1779_s21 }
 0x2ef   : > { %1088 = vrot.lane.b32.xlu0 %v1065_v32, %s1772_s27 }
 0x2f0   : > { %1326 = vrot.lane.b32.xlu1 %v1014_v25, %s1783_s29 }
 0x2f3   : > { %1137 = vrot.lane.b32.xlu0 %v1114_v26, %s1779_s21 }
 0x2f4   : > { %1186 = vrot.lane.b32.xlu1 %v1163_v33, %s1782_s26 }
 0x2f7   : > { %1234 = vrot.lane.b32.xlu0 %v1065_v32, %s1780_s22 }
 0x2f8   : > { %1086 = vrot.lane.b32.xlu1 %v1064_v22, %s1772_s27 }
 0x2fb   : > { %1283 = vrot.lane.b32.xlu0 %v1114_v26, %s1781_s23 }
 0x2fc   : > { %1135 = vrot.lane.b32.xlu1 %v1113_v28, %s1779_s21 }
 0x2ff   : > { %990 = vrot.lane.b32.xlu0 %v1113_v28, %s1773_s28 }
 0x300   : > { %1184 = vrot.lane.b32.xlu1 %v1162_v0, %s1782_s26 }
 0x301   : > { %v1126_v34 = vpop.permute.xlu0 %1125 }
 0x302   : > { %v1077_v31 = vpop.permute.xlu1 %1076 }
 0x303   : > { %1039 = vrot.lane.b32.xlu0 %v1162_v0, %s1777_s7  ;;  %s1609_s7 = sshll.u32 %s2313_s19, 3 }
 0x304   : > { %1334 = vrot.lane.b32.xlu1 %v1311_v30, %s1783_s29 }
 0x305   : > { %v1175_v36 = vpop.permute.xlu0 %1174 }
 0x306   : > { %v981_v35 = vpop.permute.xlu1 %980 }
 0x307   : > { %1003 = vst.msk [vmem:[#allocation5 + $0x10] sm:$0xff] %vm1000_vm14, %v981_v35  ;;  %1232 = vrot.lane.b32.xlu0 %v1064_v22, %s1780_s22 }
 0x309   : > { %v1075_v38 = vpop.permute.xlu0 %1074 }
 0x30a   : > { %v1030_v37 = vpop.permute.xlu1 %1029  ;;  %1099 = vst.msk [vmem:[#allocation5] sm:$0xff] %vm1098_vm0, %v1075_v38 }
 0x30b   : > { %1052 = vst.msk [vmem:[#allocation5 + $0x10] sm:$0xff] %vm1049_vm15, %v1030_v37  ;;  %1281 = vrot.lane.b32.xlu0 %v1113_v28, %s1781_s23  ;;  %s222_s23 = scalar_lea.vmem %s2310_s5, %s1609_s7 }
 0x30d   : > { %v1124_v40 = vpop.permute.xlu0 %1123 }
 0x30e   : > { %v1223_v39 = vpop.permute.xlu1 %1222  ;;  %1148 = vst.msk [vmem:[#allocation5] sm:$0xff] %vm1147_vm1, %v1124_v40 }
 0x30f   : > { %1330 = vrot.lane.b32.xlu0 %v1162_v0, %s1783_s29 }
 0x312   : > { %v1272_v41 = vpop.permute.xlu1 %1271 }
 0x313   : > { %1332 = vrot.lane.b32.xlu0 %v1163_v33, %s1783_s29 }
 0x316   : > { %v1321_v42 = vpop.permute.xlu1 %1320 }
 0x31a   : > { %v979_v43 = vpop.permute.xlu1 %978 }
 0x31b   : > { %1002 = vst.msk [vmem:[#allocation5 + $0x8] sm:$0xff] %vm1000_vm14, %v979_v43 }
 0x31e   : > { %v1028_v44 = vpop.permute.xlu1 %1027 }
 0x31f   : > { %1051 = vst.msk [vmem:[#allocation5 + $0x8] sm:$0xff] %vm1049_vm15, %v1028_v44 }
 0x320   : > { %1100 = vst.msk [vmem:[#allocation5 + $0x8] sm:$0xff] %vm1098_vm0, %v1077_v31 }
 0x321   : > { %1149 = vst.msk [vmem:[#allocation5 + $0x8] sm:$0xff] %vm1147_vm1, %v1126_v34  ;;  %v1081_v46 = vpop.permute.xlu0 %1080 }
 0x322   : > { %v1173_v45 = vpop.permute.xlu1 %1172  ;;  %1198 = vst.msk [vmem:[#allocation5 + $0x8] sm:$0xff] %vm1196_vm2, %v1175_v36 }
 0x323   : > { %1197 = vst.msk [vmem:[#allocation5] sm:$0xff] %vm1196_vm2, %v1173_v45 }
 0x324   : > { %1247 = vst.msk [vmem:[#allocation5] sm:$0xff] %vm1246_vm3, %v1223_v39 }
 0x325   : > { %1296 = vst.msk [vmem:[#allocation5] sm:$0xff] %vm1295_vm4, %v1272_v41  ;;  %v985_v48 = vpop.permute.xlu0 %984 }
 0x326   : > { %1345 = vst.msk [vmem:[#allocation5] sm:$0xff] %vm1344_vm5, %v1321_v42  ;;  %v1130_v47 = vpop.permute.xlu1 %1129 }
 0x327   : > { %1005 = vst.msk [vmem:[#allocation5 + $0x20] sm:$0xff] %vm1000_vm14, %v985_v48 }
 0x329   : > { %v1179_v50 = vpop.permute.xlu0 %1178 }
 0x32a   : > { %v1034_v49 = vpop.permute.xlu1 %1033 }
 0x32b   : > { %1054 = vst.msk [vmem:[#allocation5 + $0x20] sm:$0xff] %vm1049_vm15, %v1034_v49 }
 0x32d   : > { %v1353_v51 = vld [vmem:[#allocation5] sm:$0xff]  ;;  %v983_v53 = vpop.permute.xlu0 %982 }
 0x32e   : > { %v1227_v52 = vpop.permute.xlu1 %1226  ;;  %1702 = vmatprep.mubr.msk.f32.mxu1 %vm1377_vm6, %v1353_v51  ;;  %1004 = vst.msk [vmem:[#allocation5 + $0x18] sm:$0xff] %vm1000_vm14, %v983_v53 }
 0x331   : > { %v1032_v55 = vpop.permute.xlu0 %1031 }
 0x332   : > { %v1276_v54 = vpop.permute.xlu1 %1275  ;;  %1053 = vst.msk [vmem:[#allocation5 + $0x18] sm:$0xff] %vm1049_vm15, %v1032_v55 }
 0x333   : > { %1102 = vst.msk [vmem:[#allocation5 + $0x18] sm:$0xff] %vm1098_vm0, %v1081_v46 }
 0x334   : > { %1151 = vst.msk [vmem:[#allocation5 + $0x18] sm:$0xff] %vm1147_vm1, %v1130_v47 }
 0x335   : > { %1200 = vst.msk [vmem:[#allocation5 + $0x18] sm:$0xff] %vm1196_vm2, %v1179_v50  ;;  %v1225_v57 = vpop.permute.xlu0 %1224 }
 0x336   : > { %v1325_v56 = vpop.permute.xlu1 %1324  ;;  %1248 = vst.msk [vmem:[#allocation5 + $0x8] sm:$0xff] %vm1246_vm3, %v1225_v57 }
 0x339   : > { %v1274_v59 = vpop.permute.xlu0 %1273 }
 0x33a   : > { %v1079_v58 = vpop.permute.xlu1 %1078  ;;  %1297 = vst.msk [vmem:[#allocation5 + $0x8] sm:$0xff] %vm1295_vm4, %v1274_v59 }
 0x33b   : > { %1101 = vst.msk [vmem:[#allocation5 + $0x10] sm:$0xff] %vm1098_vm0, %v1079_v58 }
 0x33d   : > { %v1177_v61 = vpop.permute.xlu0 %1176 }
 0x33e   : > { %v1128_v60 = vpop.permute.xlu1 %1127 }
 0x33f   : > { %1150 = vst.msk [vmem:[#allocation5 + $0x10] sm:$0xff] %vm1147_vm1, %v1128_v60 }
 0x340   : > { %1199 = vst.msk [vmem:[#allocation5 + $0x10] sm:$0xff] %vm1196_vm2, %v1177_v61 }
 0x341   : > { %1249 = vst.msk [vmem:[#allocation5 + $0x10] sm:$0xff] %vm1246_vm3, %v1227_v52  ;;  %v1085_v63 = vpop.permute.xlu0 %1084 }
 0x342   : > { %1298 = vst.msk [vmem:[#allocation5 + $0x10] sm:$0xff] %vm1295_vm4, %v1276_v54  ;;  %v1323_v62 = vpop.permute.xlu1 %1322 }
 0x343   : > { %1347 = vst.msk [vmem:[#allocation5 + $0x10] sm:$0xff] %vm1344_vm5, %v1325_v56  ;;  %1346 = vst.msk [vmem:[#allocation5 + $0x8] sm:$0xff] %vm1344_vm5, %v1323_v62 }
 0x345   : > { %v989_v2 = vpop.permute.xlu0 %988 }
 0x346   : > { %v1134_v1 = vpop.permute.xlu1 %1133  ;;  %1007 = vst.msk [vmem:[#allocation5 + $0x30] sm:$0xff] %vm1000_vm14, %v989_v2 }
 0x349   : > { %v1183_v4 = vpop.permute.xlu0 %1182 }
 0x34a   : > { %v1038_v3 = vpop.permute.xlu1 %1037  ;;  %v1354_v5 = vld [vmem:[#allocation5 + $0x8] sm:$0xff]  ;;  %v1355_v6 = vld [vmem:[#allocation5 + $0x10] sm:$0xff] }
 0x34b   : > { %1056 = vst.msk [vmem:[#allocation5 + $0x30] sm:$0xff] %vm1049_vm15, %v1038_v3  ;;  %1703 = vmatmul.mubr.msk.f32.vlgmr.msra.gmra.mrb[0].mxu1 %vm1377_vm6, %v1354_v5 }
 0x34c   : > { %1705 = vmatprep.mubr.msk.f32.mxu1 %vm1377_vm6, %v1355_v6 }
 0x34d   : > { %v987_v8 = vpop.permute.xlu0 %986 }
 0x34e   : > { %v1231_v7 = vpop.permute.xlu1 %1230  ;;  %1006 = vst.msk [vmem:[#allocation5 + $0x28] sm:$0xff] %vm1000_vm14, %v987_v8 }
 0x351   : > { %v1036_v10 = vpop.permute.xlu0 %1035 }
 0x352   : > { %v1280_v9 = vpop.permute.xlu1 %1279  ;;  %1055 = vst.msk [vmem:[#allocation5 + $0x28] sm:$0xff] %vm1049_vm15, %v1036_v10 }
 0x353   : > { %1104 = vst.msk [vmem:[#allocation5 + $0x28] sm:$0xff] %vm1098_vm0, %v1085_v63 }
 0x354   : > { %1153 = vst.msk [vmem:[#allocation5 + $0x28] sm:$0xff] %vm1147_vm1, %v1134_v1 }
 0x355   : > { %1202 = vst.msk [vmem:[#allocation5 + $0x28] sm:$0xff] %vm1196_vm2, %v1183_v4  ;;  %v1229_v12 = vpop.permute.xlu0 %1228 }
 0x356   : > { %v1329_v11 = vpop.permute.xlu1 %1328  ;;  %1250 = vst.msk [vmem:[#allocation5 + $0x18] sm:$0xff] %vm1246_vm3, %v1229_v12 }
 0x359   : > { %v1278_v14 = vpop.permute.xlu0 %1277 }
 0x35a   : > { %v1083_v13 = vpop.permute.xlu1 %1082  ;;  %1299 = vst.msk [vmem:[#allocation5 + $0x18] sm:$0xff] %vm1295_vm4, %v1278_v14 }
 0x35b   : > { %1103 = vst.msk [vmem:[#allocation5 + $0x20] sm:$0xff] %vm1098_vm0, %v1083_v13 }
 0x35d   : > { %v1181_v16 = vpop.permute.xlu0 %1180 }
 0x35e   : > { %v1132_v15 = vpop.permute.xlu1 %1131 }
 0x35f   : > { %1152 = vst.msk [vmem:[#allocation5 + $0x20] sm:$0xff] %vm1147_vm1, %v1132_v15 }
 0x360   : > { %1201 = vst.msk [vmem:[#allocation5 + $0x20] sm:$0xff] %vm1196_vm2, %v1181_v16 }
 0x361   : > { %1251 = vst.msk [vmem:[#allocation5 + $0x20] sm:$0xff] %vm1246_vm3, %v1231_v7  ;;  %v1089_v18 = vpop.permute.xlu0 %1088 }
 0x362   : > { %1300 = vst.msk [vmem:[#allocation5 + $0x20] sm:$0xff] %vm1295_vm4, %v1280_v9  ;;  %v1327_v17 = vpop.permute.xlu1 %1326 }
 0x363   : > { %1349 = vst.msk [vmem:[#allocation5 + $0x20] sm:$0xff] %vm1344_vm5, %v1329_v11  ;;  %1348 = vst.msk [vmem:[#allocation5 + $0x18] sm:$0xff] %vm1344_vm5, %v1327_v17 }
 0x365   : > { %v1138_v20 = vpop.permute.xlu0 %1137 }
 0x366   : > { %v1187_v19 = vpop.permute.xlu1 %1186 }
 0x369   : > { %v1235_v22 = vpop.permute.xlu0 %1234 }
 0x36a   : > { %v1087_v21 = vpop.permute.xlu1 %1086  ;;  %v1356_v23 = vld [vmem:[#allocation5 + $0x18] sm:$0xff]  ;;  %v1357_v24 = vld [vmem:[#allocation5 + $0x20] sm:$0xff] }
 0x36b   : > { %1105 = vst.msk [vmem:[#allocation5 + $0x30] sm:$0xff] %vm1098_vm0, %v1087_v21  ;;  %1706 = vmatmul.mubr.msk.f32.gmra.mrb[2].mxu1 %vm1377_vm6, %v1356_v23 }
 0x36c   : > { %1708 = vmatprep.mubr.msk.f32.mxu1 %vm1377_vm6, %v1357_v24 }
 0x36d   : > { %v1284_v32 = vpop.permute.xlu0 %1283 }
 0x36e   : > { %v1136_v25 = vpop.permute.xlu1 %1135 }
 0x36f   : > { %1154 = vst.msk [vmem:[#allocation5 + $0x30] sm:$0xff] %vm1147_vm1, %v1136_v25 }
 0x371   : > { %v991_v26 = vpop.permute.xlu0 %990 }
 0x372   : > { %v1185_v33 = vpop.permute.xlu1 %1184  ;;  %1008 = vst.msk [vmem:[#allocation5 + $0x38] sm:$0xff] %vm1000_vm14, %v991_v26 }
 0x373   : > { %1203 = vst.msk [vmem:[#allocation5 + $0x30] sm:$0xff] %vm1196_vm2, %v1185_v33 }
 0x374   : > { %1253 = vst.msk [vmem:[#allocation5 + $0x30] sm:$0xff] %vm1246_vm3, %v1235_v22 }
 0x375   : > { %1302 = vst.msk [vmem:[#allocation5 + $0x30] sm:$0xff] %vm1295_vm4, %v1284_v32  ;;  %v1040_v28 = vpop.permute.xlu0 %1039 }
 0x376   : > { %1057 = vst.msk [vmem:[#allocation5 + $0x38] sm:$0xff] %vm1049_vm15, %v1040_v28  ;;  %v1335_v30 = vpop.permute.xlu1 %1334 }
 0x377   : > { %1106 = vst.msk [vmem:[#allocation5 + $0x38] sm:$0xff] %vm1098_vm0, %v1089_v18 }
 0x378   : > { %1155 = vst.msk [vmem:[#allocation5 + $0x38] sm:$0xff] %vm1147_vm1, %v1138_v20 }
 0x379   : > { %1204 = vst.msk [vmem:[#allocation5 + $0x38] sm:$0xff] %vm1196_vm2, %v1187_v19  ;;  %v1233_v0 = vpop.permute.xlu0 %1232 }
 0x37a   : > { %1252 = vst.msk [vmem:[#allocation5 + $0x28] sm:$0xff] %vm1246_vm3, %v1233_v0  ;;  %1254 = vst.msk [vmem:[#allocation5 + $0x38] sm:$0xff] %vm1246_vm3, %v2207_v27  ;;  %v1620_v27 = vld [vmem:[%s2309_s4] ss:$0 sm:$0xff] }
 0x37b   : > { %1303 = vst.msk [vmem:[#allocation5 + $0x38] sm:$0xff] %vm1295_vm4, %v2213_v29 }
 0x37c   : > { %1352 = vst.msk [vmem:[#allocation5 + $0x38] sm:$0xff] %vm1344_vm5, %v1335_v30 }
 0x37d   : > { %v1282_v31 = vpop.permute.xlu0 %1281 }
 0x37e   : > { %1301 = vst.msk [vmem:[#allocation5 + $0x28] sm:$0xff] %vm1295_vm4, %v1282_v31 }
 0x381   : > { %v1331_v34 = vpop.permute.xlu0 %1330 }
 0x382   : > { %1350 = vst.msk [vmem:[#allocation5 + $0x28] sm:$0xff] %vm1344_vm5, %v1331_v34 }
 0x383   : > { %v1360_v37 = vld [vmem:[#allocation5 + $0x38] sm:$0xff] }
 0x385   : > { %v1333_v35 = vpop.permute.xlu0 %1332 }
 0x386   : > { %1351 = vst.msk [vmem:[#allocation5 + $0x30] sm:$0xff] %vm1344_vm5, %v1333_v35 }
 0x389   : > { %v1358_v36 = vld [vmem:[#allocation5 + $0x28] sm:$0xff] }
 0x38a   : > { %1709 = vmatmul.mubr.msk.f32.gmra.mrb[4].mxu1 %vm1377_vm6, %v1358_v36 }
 0x38d   : > { %v1359_v38 = vld [vmem:[#allocation5 + $0x30] sm:$0xff] }
 0x38e   : > { %1711 = vmatprep.mubr.msk.f32.mxu1 %vm1377_vm6, %v1359_v38 }
 0x38f   : > { %1712 = vmatmul.mubr.msk.f32.gmra.mrb[6].mxu1 %vm1377_vm6, %v1360_v37 }
 0x41e   : > { %v1704_v29 = vpop.f32.mrb[0].mxu1 }
 0x41f   : > { %v1468_v39 = vpop.f32.mrb[1].mxu1  ;;  %v1474_v41 = vadd.f32 %v1704_v29, %v1620_v27 }
 0x420   : > { %v1469_v40 = vadd.f32 %v1620_v27, %v1468_v39 }
 0x421   : > { %v1508_v43 = vmax.f32 %v1474_v41, 0.0 }
 0x422   : > { %v1507_v42 = vmax.f32 %v1469_v40, 0.0 }
 0x424   : > { %1515 = vxpose.xlu0.b32.start [1/8] (short) (narrow) %v1507_v42, 8 }
 0x428   : > { %1516 = vxpose.xlu0.b32.cont [2/8] (short) (narrow) %v1508_v43, 8 }
 0x43e   : > { %v1707_v44 = vpop.f32.mrb[2].mxu1 }
 0x43f   : > { %v1478_v45 = vpop.f32.mrb[3].mxu1  ;;  %v1484_v47 = vadd.f32 %v1707_v44, %v1620_v27 }
 0x440   : > { %v1479_v46 = vadd.f32 %v1620_v27, %v1478_v45 }
 0x441   : > { %v1510_v49 = vmax.f32 %v1484_v47, 0.0 }
 0x442   : > { %v1509_v48 = vmax.f32 %v1479_v46, 0.0 }
 0x444   : > { %1517 = vxpose.xlu0.b32.cont [3/8] (short) (narrow) %v1509_v48, 8 }
 0x448   : > { %1518 = vxpose.xlu0.b32.cont [4/8] (short) (narrow) %v1510_v49, 8 }
 0x45d   : > { %v1710_v50 = vpop.f32.mrb[4].mxu1 }
 0x45e   : > { %v1488_v51 = vpop.f32.mrb[5].mxu1  ;;  %v1494_v53 = vadd.f32 %v1710_v50, %v1620_v27 }
 0x45f   : > { %v1489_v52 = vadd.f32 %v1620_v27, %v1488_v51 }
 0x460   : > { %v1512_v58 = vmax.f32 %v1494_v53, 0.0 }
 0x461   : > { %v1511_v54 = vmax.f32 %v1489_v52, 0.0 }
 0x462   : > { %v1713_v55 = vpop.f32.mrb[6].mxu1 }
 0x463   : > { %1519 = vxpose.xlu0.b32.cont [5/8] (short) (narrow) %v1511_v54, 8  ;;  %v1498_v56 = vpop.f32.mrb[7].mxu1  ;;  %v1504_v60 = vadd.f32 %v1713_v55, %v1620_v27 }
 0x464   : > { %v1499_v57 = vadd.f32 %v1620_v27, %v1498_v56 }
 0x465   : > { %v1514_v61 = vmax.f32 %v1504_v60, 0.0 }
 0x466   : > { %v1513_v59 = vmax.f32 %v1499_v57, 0.0 }
 0x467   : > { %1520 = vxpose.xlu0.b32.cont [6/8] (short) (narrow) %v1512_v58, 8 }
 0x46b   : > { %1521 = vxpose.xlu0.b32.cont [7/8] (short) (narrow) %v1513_v59, 8 }
 0x46f   : > { %1522 = vxpose.xlu0.b32.end [8/8] (short) (narrow) %v1514_v61, 8 }
 0x4d3   : > { %v1531_v62 = vpop.trf.xlu0 }
 0x4d4   : > { %1548 = vst.msk [vmem:[%s222_s23] sm:$0xff] %vm1547_vm7, %v1531_v62 }
 0x4d5 PF: > { %s15_s18 = sadd.s32 1, %s1767_s18  }
 0x4d6   : > { %p12_p4 = scmp.ge.s32.totalorder %s15_s18, 4  }
 0x4d8   :  { %14 = sbr.rel (!%p12_p4) target bundleno = 1 (0x1), region = 74 }

</bundles_post_ra>
